<compile_context>
chip_gen: v7x
topology: tpu7x:2x2x1
jax: 0.10.0
libtpu: 0.0.40
codegen_flags: <defaults>
</compile_context>

<pallas_src>
import jax
import jax.numpy as jnp
from jax import lax
from jax.experimental import pallas as pl
from jax.experimental.pallas import tpu as pltpu

LANE = 128
SUBLANE_BF16 = 16   # native bf16 sublane tile
TB_MAX = 16         # max timesteps per grid iteration (fully unrolled)


def _round_up(n, m):
    return ((n + m - 1) // m) * m


# -----------------------------------------------------------------------------
# Kernel: one block of Tb timesteps per grid iteration.
# -----------------------------------------------------------------------------
def rnn_rollout_kernel(
    x_ref,      # (Tb*Bp, Dxp)   bf16  inputs for this time block (streamed)
    h0_ref,     # (Bp, Hp)       f32   initial hidden state
    w1_ref,     # (Dxp, Hp)      bf16  fc1 weight (pre-transposed)
    b1_ref,     # (1, Hp)        f32   fc1 bias
    wgx_ref,    # (Hp, 3*Hp)     bf16  input-side gate weights [W_ir|W_iz|W_in]
    bgx_ref,    # (1, 3*Hp)      f32   [b_ir+b_hr | b_iz+b_hz | b_in]
    wgh_ref,    # (Hp, 3*Hp)     bf16  hidden-side gate weights [W_hr|W_hz|W_hn]
    bhn_ref,    # (1, Hp)        f32   b_hn (added to gh_n before r*)
    w2_ref,     # (Hp, Ap)       bf16  fc2 weight (pre-transposed)
    b2_ref,     # (1, Ap)        f32   fc2 bias
    q_ref,      # out (Tb*Bp, Ap) f32  Q values for this time block
    hT_ref,     # out (Bp, Hp)    f32  hidden carry (resident across grid) + final h
    gi_scr,     # scratch (Tb*Bp, 3*Hp) f32
    hall_scr,   # scratch (Tb*Bp, Hp)   bf16
):
    bp = h0_ref.shape[0]
    Hp = h0_ref.shape[-1]
    tb = x_ref.shape[0] // bp

    # Initialize the resident hidden-state block on the first time block.
    @pl.when(pl.program_id(0) == 0)
    def _():
        hT_ref[...] = h0_ref[...]

    # ---- Time-hoisted x-side compute (M = Tb*Bp rows per MXU pass) ----------
    # fc1 + ReLU for all Tb steps at once.
    x1 = jnp.dot(x_ref[...], w1_ref[...], preferred_element_type=jnp.float32)
    x1 = jnp.maximum(x1 + b1_ref[...], 0.0)
    # Input-side gate pre-activations for all Tb steps at once.
    gi_scr[...] = jnp.dot(x1.astype(jnp.bfloat16), wgx_ref[...],
                          preferred_element_type=jnp.float32) + bgx_ref[...]

    wgh = wgh_ref[...]
    b_hn = jnp.broadcast_to(bhn_ref[...], (bp, Hp))   # hoisted out of the loop

    # ---- Serial recurrence: only h @ Wgh + gate math remains per step -------
    def step(t, h):
        off = pl.multiple_of(t * bp, bp)
        gi = gi_scr[pl.ds(off, bp), :]                               # (Bp, 3*Hp)
        gh = jnp.dot(h.astype(jnp.bfloat16), wgh,
                     preferred_element_type=jnp.float32)             # (Bp, 3*Hp)
        r = jax.nn.sigmoid(gi[:, 0 * Hp:1 * Hp] + gh[:, 0 * Hp:1 * Hp])
        z = jax.nn.sigmoid(gi[:, 1 * Hp:2 * Hp] + gh[:, 1 * Hp:2 * Hp])
        n = jnp.tanh(gi[:, 2 * Hp:3 * Hp] + r * (gh[:, 2 * Hp:3 * Hp] + b_hn))
        h_new = n + z * (h - n)                                      # == (1-z)*n + z*h
        hall_scr[pl.ds(off, bp), :] = h_new.astype(jnp.bfloat16)
        return h_new

    h_final = lax.fori_loop(0, tb, step, hT_ref[...], unroll=True)
    hT_ref[...] = h_final

    # ---- Deferred fc2: one big matmul + one lane-dense store per block ------
    q = jnp.dot(hall_scr[...], w2_ref[...], preferred_element_type=jnp.float32)
    q_ref[...] = q + b2_ref[...]


# -----------------------------------------------------------------------------
# Parameter packing: split gate weights into x-part / h-part, lane-align to 128,
# fold r/z biases into the x-side bias, cast matmul operands to bf16.
# -----------------------------------------------------------------------------
def pack_params(params):
    w1, b1 = params["w1"], params["b1"]
    w_ih, b_ih = params["w_ih"], params["b_ih"]
    w_hh, b_hh = params["w_hh"], params["b_hh"]
    w2, b2 = params["w2"], params["b2"]

    D_in, H = w1.shape
    A = w2.shape[1]
    Dxp = _round_up(D_in, 8)            # pad feature dim only to sublane multiple
    Hp = _round_up(H, LANE)
    Ap = _round_up(A, LANE)
    f32 = jnp.float32

    w1_p = jnp.zeros((Dxp, Hp), f32).at[:D_in, :H].set(w1).astype(jnp.bfloat16)
    b1_p = jnp.zeros((1, Hp), f32).at[:, :H].set(b1)

    # PyTorch GRU gate order (r, z, n); weights stored as (H, 3H) = W.T.
    W_ir, W_iz, W_in = w_ih[:, :H], w_ih[:, H:2 * H], w_ih[:, 2 * H:]
    W_hr, W_hz, W_hn = w_hh[:, :H], w_hh[:, H:2 * H], w_hh[:, 2 * H:]
    b_ir, b_iz, b_in = b_ih[:, :H], b_ih[:, H:2 * H], b_ih[:, 2 * H:]
    b_hr, b_hz, b_hn = b_hh[:, :H], b_hh[:, H:2 * H], b_hh[:, 2 * H:]

    wgx = jnp.zeros((Hp, 3 * Hp), f32)
    wgx = wgx.at[:H, 0 * Hp:0 * Hp + H].set(W_ir)
    wgx = wgx.at[:H, 1 * Hp:1 * Hp + H].set(W_iz)
    wgx = wgx.at[:H, 2 * Hp:2 * Hp + H].set(W_in)
    wgx = wgx.astype(jnp.bfloat16)

    wgh = jnp.zeros((Hp, 3 * Hp), f32)
    wgh = wgh.at[:H, 0 * Hp:0 * Hp + H].set(W_hr)
    wgh = wgh.at[:H, 1 * Hp:1 * Hp + H].set(W_hz)
    wgh = wgh.at[:H, 2 * Hp:2 * Hp + H].set(W_hn)
    wgh = wgh.astype(jnp.bfloat16)

    bgx = jnp.zeros((1, 3 * Hp), f32)
    bgx = bgx.at[:, 0 * Hp:0 * Hp + H].set(b_ir + b_hr)   # r biases pre-folded
    bgx = bgx.at[:, 1 * Hp:1 * Hp + H].set(b_iz + b_hz)   # z biases pre-folded
    bgx = bgx.at[:, 2 * Hp:2 * Hp + H].set(b_in)

    bhn_p = jnp.zeros((1, Hp), f32).at[:, :H].set(b_hn)

    w2_p = jnp.zeros((Hp, Ap), f32).at[:H, :A].set(w2).astype(jnp.bfloat16)
    b2_p = jnp.zeros((1, Ap), f32).at[:, :A].set(b2)

    return dict(w1=w1_p, b1=b1_p, wgx=wgx, bgx=bgx, wgh=wgh, bhn=bhn_p,
                w2=w2_p, b2=b2_p,
                D_in=D_in, H=H, A=A, Dxp=Dxp, Hp=Hp, Ap=Ap)


def _pick_time_block(T):
    """Largest divisor of T that is <= TB_MAX (falls back to 1)."""
    tb = 1
    for d in range(1, min(T, TB_MAX) + 1):
        if T % d == 0:
            tb = d
    return tb


# -----------------------------------------------------------------------------
# Wrappers
# -----------------------------------------------------------------------------
def rnn_agent_rollout(img_seq, hidden_state, packed):
    """Run T GRU steps in ONE pallas_call (weights DMA'd once, h stays in VMEM).

    img_seq: (T, B, D_in) f32, hidden_state: (B, H) (or anything reshapeable).
    Returns (q_seq (T, B, A) f32, h_final (B, H) f32).
    """
    T, B, D_in = img_seq.shape
    H, A = packed["H"], packed["A"]
    Dxp, Hp, Ap = packed["Dxp"], packed["Hp"], packed["Ap"]
    assert D_in == packed["D_in"]

    Bp = _round_up(B, SUBLANE_BF16)
    tb = _pick_time_block(T)
    n_blocks = T // tb

    x = jnp.zeros((T, Bp, Dxp), jnp.float32).at[:, :B, :D_in].set(img_seq)
    x = x.astype(jnp.bfloat16).reshape(T * Bp, Dxp)
    h0 = jnp.asarray(hidden_state, jnp.float32).reshape(-1, H)
    h0p = jnp.zeros((Bp, Hp), jnp.float32).at[:B, :H].set(h0)

    def const(shape):
        nd = len(shape)
        return pl.BlockSpec(shape, lambda i, _nd=nd: (0,) * _nd)

    q_flat, h_out = pl.pallas_call(
        rnn_rollout_kernel,
        out_shape=(
            jax.ShapeDtypeStruct((T * Bp, Ap), jnp.float32),
            jax.ShapeDtypeStruct((Bp, Hp), jnp.float32),
        ),
        grid_spec=pltpu.PrefetchScalarGridSpec(
            num_scalar_prefetch=0,
            grid=(n_blocks,),
            in_specs=[
                pl.BlockSpec((tb * Bp, Dxp), lambda i: (i, 0)),  # x block (streamed)
                const((Bp, Hp)),                                 # h0 (DMA once)
                const((Dxp, Hp)), const((1, Hp)),                # fc1 (resident)
                const((Hp, 3 * Hp)), const((1, 3 * Hp)),         # x-side gates (resident)
                const((Hp, 3 * Hp)), const((1, Hp)),             # h-side gates (resident)
                const((Hp, Ap)), const((1, Ap)),                 # fc2 (resident)
            ],
            out_specs=(
                pl.BlockSpec((tb * Bp, Ap), lambda i: (i, 0)),   # q per time block
                const((Bp, Hp)),                                 # resident h carry
            ),
            scratch_shapes=[
                pltpu.VMEM((tb * Bp, 3 * Hp), jnp.float32),      # gi slab
                pltpu.VMEM((tb * Bp, Hp), jnp.bfloat16),         # h_all slab
            ],
        ),
        compiler_params=pltpu.CompilerParams(
            # Time-block axis is a true recurrence -> must stay sequential.
            dimension_semantics=("arbitrary",),
        ),
    )(x, h0p, packed["w1"], packed["b1"], packed["wgx"], packed["bgx"],
      packed["wgh"], packed["bhn"], packed["w2"], packed["b2"])

    q_seq = q_flat.reshape(T, Bp, Ap)[:, :B, :A]
    return q_seq, h_out[:B, :H]


def rnn_agent_forward(img, hidden_state, packed):
    """Exact equivalent of RNNAgent.forward (single step) = T=1 rollout."""
    q_seq, h = rnn_agent_rollout(img[None], hidden_state, packed)
    return q_seq[0], h


# -----------------------------------------------------------------------------
# Reference implementations (pure JAX) for verification.
# -----------------------------------------------------------------------------
def reference_rollout(img_seq, hidden_state, params, *, mirror_bf16=False):
    """PyTorch-semantics rollout.  mirror_bf16=True reproduces the kernel's
    bf16 operand rounding (f32 accumulation) for a tight numerical check.
    NOTE: bf16 re-quantization of h compounds over T; tolerances below are
    tuned for short rollouts (T <= ~16)."""
    cast = ((lambda a: a.astype(jnp.bfloat16).astype(jnp.float32))
            if mirror_bf16 else (lambda a: a))
    w1, w_ih, w_hh, w2 = map(cast, (params["w1"], params["w_ih"],
                                    params["w_hh"], params["w2"]))
    b1, b_ih, b_hh, b2 = params["b1"], params["b_ih"], params["b_hh"], params["b2"]
    H = params["w1"].shape[1]
    h = jnp.asarray(hidden_state, jnp.float32).reshape(-1, H)
    qs = []
    for t in range(img_seq.shape[0]):
        x = cast(img_seq[t])
        x1 = jax.nn.relu(x @ w1 + b1)
        gi = cast(x1) @ w_ih + b_ih
        gh = cast(h) @ w_hh + b_hh
        r = jax.nn.sigmoid(gi[:, :H] + gh[:, :H])
        z = jax.nn.sigmoid(gi[:, H:2 * H] + gh[:, H:2 * H])
        n = jnp.tanh(gi[:, 2 * H:] + r * gh[:, 2 * H:])
        h = (1.0 - z) * n + z * h
        qs.append(cast(h) @ w2 + b2)
    return jnp.stack(qs), h


def init_params(key, input_shape, hidden_dim, n_actions):
    """Deterministic synthetic parameters (PyTorch-shaped, stored pre-transposed)."""
    ks = jax.random.split(key, 8)
    s = 0.1
    return {
        "w1":   s * jax.random.normal(ks[0], (input_shape, hidden_dim), jnp.float32),
        "b1":   s * jax.random.normal(ks[1], (1, hidden_dim), jnp.float32),
        "w_ih": s * jax.random.normal(ks[2], (hidden_dim, 3 * hidden_dim), jnp.float32),
        "b_ih": s * jax.random.normal(ks[3], (1, 3 * hidden_dim), jnp.float32),
        "w_hh": s * jax.random.normal(ks[4], (hidden_dim, 3 * hidden_dim), jnp.float32),
        "b_hh": s * jax.random.normal(ks[5], (1, 3 * hidden_dim), jnp.float32),
        "w2":   s * jax.random.normal(ks[6], (hidden_dim, n_actions), jnp.float32),
        "b2":   s * jax.random.normal(ks[7], (1, n_actions), jnp.float32),
    }


if __name__ == "__main__":
    batch = 8
    input_shape = 64
    rnn_hidden_dim = 32
    n_actions = 16
    T = 8                      # rollout length amortizing launch + weight DMA

    key = jax.random.PRNGKey(0)
    k_img, k_h, k_p = jax.random.split(key, 3)
    img_seq = jax.random.normal(k_img, (T, batch, input_shape), jnp.float32)
    h0 = jax.random.normal(k_h, (batch, rnn_hidden_dim), jnp.float32)
    params = init_params(k_p, input_shape, rnn_hidden_dim, n_actions)
    packed = pack_params(params)

    # Full rollout in one kernel launch.
    q_seq, h_T = rnn_agent_rollout(img_seq, h0, packed)
    q_seq = jax.block_until_ready(q_seq)
    h_T = jax.block_until_ready(h_T)

    # Single-step forward (the module's forward signature) = T=1 special case.
    q1, h1 = rnn_agent_forward(img_seq[0], h0, packed)
    q1 = jax.block_until_ready(q1)
    h1 = jax.block_until_ready(h1)

    assert q_seq.shape == (T, batch, n_actions) and h_T.shape == (batch, rnn_hidden_dim)
    assert q1.shape == (batch, n_actions) and h1.shape == (batch, rnn_hidden_dim)

    # Tight check: reference that mirrors the kernel's bf16 operand rounding.
    q_mbf, h_mbf = reference_rollout(img_seq, h0, params, mirror_bf16=True)
    assert jnp.allclose(q_seq, q_mbf, atol=2e-3, rtol=2e-3), \
        float(jnp.max(jnp.abs(q_seq - q_mbf)))
    assert jnp.allclose(h_T, h_mbf, atol=2e-3, rtol=2e-3), \
        float(jnp.max(jnp.abs(h_T - h_mbf)))

    # Loose check: exact f32 PyTorch semantics (difference = bf16 weight/operand quantization).
    q_f32, h_f32 = reference_rollout(img_seq, h0, params, mirror_bf16=False)
    assert jnp.allclose(q_seq, q_f32, atol=3e-2, rtol=3e-2), \
        float(jnp.max(jnp.abs(q_seq - q_f32)))
    assert jnp.allclose(h_T, h_f32, atol=3e-2, rtol=3e-2), \
        float(jnp.max(jnp.abs(h_T - h_f32)))

    # Single-step consistency with step 0 of the rollout.
    assert jnp.allclose(q1, q_seq[0], atol=1e-5, rtol=1e-5)
    assert jnp.allclose(h1, reference_rollout(img_seq[:1], h0, params,
                                              mirror_bf16=True)[1],
                        atol=2e-3, rtol=2e-3)

    print("KERNEL_OK")
</pallas_src>

<mosaic_0001>
module attributes {stable_mosaic.version = 11 : i64} {
  func.func @rnn_rollout_kernel(%arg0: i32, %arg1: memref<128x64xbf16, #tpu.memory_space<vmem>>, %arg2: memref<16x128xf32, #tpu.memory_space<vmem>>, %arg3: memref<64x128xbf16, #tpu.memory_space<vmem>>, %arg4: memref<1x128xf32, #tpu.memory_space<vmem>>, %arg5: memref<128x384xbf16, #tpu.memory_space<vmem>>, %arg6: memref<1x384xf32, #tpu.memory_space<vmem>>, %arg7: memref<128x384xbf16, #tpu.memory_space<vmem>>, %arg8: memref<1x128xf32, #tpu.memory_space<vmem>>, %arg9: memref<128x128xbf16, #tpu.memory_space<vmem>>, %arg10: memref<1x128xf32, #tpu.memory_space<vmem>>, %arg11: memref<128x128xf32, #tpu.memory_space<vmem>>, %arg12: memref<16x128xf32, #tpu.memory_space<vmem>>, %arg13: memref<128x384xf32, #tpu.memory_space<vmem>>, %arg14: memref<128x128xbf16, #tpu.memory_space<vmem>>) attributes {dimension_semantics = [#tpu.dimension_semantics<arbitrary>], iteration_bounds = array<i64: 1>, scalar_prefetch = 0 : i64, scratch_operands = 2 : i64, tpu.core_type = #tpu.core_type<tc>, window_params = [{transform_indices = @transform_0, window_bounds = array<i64: 128, 64>}, {pipeline_mode = #tpu.pipeline_mode<synchronous>, transform_indices = @transform_1, window_bounds = array<i64: 16, 128>}, {pipeline_mode = #tpu.pipeline_mode<synchronous>, transform_indices = @transform_2, window_bounds = array<i64: 64, 128>}, {pipeline_mode = #tpu.pipeline_mode<synchronous>, transform_indices = @transform_3, window_bounds = array<i64: 1, 128>}, {pipeline_mode = #tpu.pipeline_mode<synchronous>, transform_indices = @transform_4, window_bounds = array<i64: 128, 384>}, {pipeline_mode = #tpu.pipeline_mode<synchronous>, transform_indices = @transform_5, window_bounds = array<i64: 1, 384>}, {pipeline_mode = #tpu.pipeline_mode<synchronous>, transform_indices = @transform_6, window_bounds = array<i64: 128, 384>}, {pipeline_mode = #tpu.pipeline_mode<synchronous>, transform_indices = @transform_7, window_bounds = array<i64: 1, 128>}, {pipeline_mode = #tpu.pipeline_mode<synchronous>, transform_indices = @transform_8, window_bounds = array<i64: 128, 128>}, {pipeline_mode = #tpu.pipeline_mode<synchronous>, transform_indices = @transform_9, window_bounds = array<i64: 1, 128>}, {transform_indices = @transform_10, window_bounds = array<i64: 128, 128>}, {pipeline_mode = #tpu.pipeline_mode<synchronous>, transform_indices = @transform_11, window_bounds = array<i64: 16, 128>}]} {
    %c0_i32 = arith.constant 0 : i32
    %0 = arith.cmpi eq, %arg0, %c0_i32 : i32
    %1 = arith.extui %0 : i1 to i32
    %c0_i32_0 = arith.constant 0 : i32
    %2 = arith.cmpi ne, %1, %c0_i32_0 : i32
    scf.if %2 {
      %c0_79 = arith.constant 0 : index
      %c0_80 = arith.constant 0 : index
      %303 = vector.load %arg2[%c0_79, %c0_80] : memref<16x128xf32, #tpu.memory_space<vmem>>, vector<16x128xf32>
      %c0_81 = arith.constant 0 : index
      %c0_82 = arith.constant 0 : index
      %304 = vector.load %arg12[%c0_81, %c0_82] : memref<16x128xf32, #tpu.memory_space<vmem>>, vector<16x128xf32>
      tpu.vector_store %arg12[%c0_81, %c0_82], %303 {strides = array<i32>} : memref<16x128xf32, #tpu.memory_space<vmem>>, vector<16x128xf32>,
    } else {
    }
    %c0 = arith.constant 0 : index
    %c0_1 = arith.constant 0 : index
    %3 = vector.load %arg1[%c0, %c0_1] : memref<128x64xbf16, #tpu.memory_space<vmem>>, vector<128x64xbf16>
    %c0_2 = arith.constant 0 : index
    %c0_3 = arith.constant 0 : index
    %4 = vector.load %arg3[%c0_2, %c0_3] : memref<64x128xbf16, #tpu.memory_space<vmem>>, vector<64x128xbf16>
    %cst = arith.constant dense<0.000000e+00> : vector<128x128xf32>
    %5 = tpu.matmul %3, %4, %cst {dimension_numbers = #tpu.dot_dimension_numbers<[1], [0], [0], [1], [0, 0, 1, 1], [], []>} : vector<128x64xbf16>, vector<64x128xbf16>, vector<128x128xf32> -> vector<128x128xf32>
    %c0_4 = arith.constant 0 : index
    %c0_5 = arith.constant 0 : index
    %6 = vector.load %arg4[%c0_4, %c0_5] : memref<1x128xf32, #tpu.memory_space<vmem>>, vector<1x128xf32>
    %7 = vector.broadcast %6 : vector<1x128xf32> to vector<128x128xf32>
    %8 = arith.addf %5, %7 : vector<128x128xf32>
    %cst_6 = arith.constant 0.000000e+00 : f32
    %9 = vector.broadcast %cst_6 : f32 to vector<128x128xf32>
    %10 = arith.maximumf %8, %9 : vector<128x128xf32>
    %11 = arith.truncf %10 : vector<128x128xf32> to vector<128x128xbf16>
    %c0_7 = arith.constant 0 : index
    %c0_8 = arith.constant 0 : index
    %12 = vector.load %arg5[%c0_7, %c0_8] : memref<128x384xbf16, #tpu.memory_space<vmem>>, vector<128x384xbf16>
    %cst_9 = arith.constant dense<0.000000e+00> : vector<128x384xf32>
    %13 = tpu.matmul %11, %12, %cst_9 {dimension_numbers = #tpu.dot_dimension_numbers<[1], [0], [0], [1], [0, 0, 1, 1], [], []>} : vector<128x128xbf16>, vector<128x384xbf16>, vector<128x384xf32> -> vector<128x384xf32>
    %c0_10 = arith.constant 0 : index
    %c0_11 = arith.constant 0 : index
    %14 = vector.load %arg6[%c0_10, %c0_11] : memref<1x384xf32, #tpu.memory_space<vmem>>, vector<1x384xf32>
    %15 = vector.broadcast %14 : vector<1x384xf32> to vector<128x384xf32>
    %16 = arith.addf %13, %15 : vector<128x384xf32>
    %c0_12 = arith.constant 0 : index
    %c0_13 = arith.constant 0 : index
    %17 = vector.load %arg13[%c0_12, %c0_13] : memref<128x384xf32, #tpu.memory_space<vmem>>, vector<128x384xf32>
    tpu.vector_store %arg13[%c0_12, %c0_13], %16 {strides = array<i32>} : memref<128x384xf32, #tpu.memory_space<vmem>>, vector<128x384xf32>,
    %c0_14 = arith.constant 0 : index
    %c0_15 = arith.constant 0 : index
    %18 = vector.load %arg7[%c0_14, %c0_15] : memref<128x384xbf16, #tpu.memory_space<vmem>>, vector<128x384xbf16>
    %c0_16 = arith.constant 0 : index
    %c0_17 = arith.constant 0 : index
    %19 = vector.load %arg8[%c0_16, %c0_17] : memref<1x128xf32, #tpu.memory_space<vmem>>, vector<1x128xf32>
    %20 = vector.shape_cast %19 : vector<1x128xf32> to vector<1x128xf32>
    %21 = vector.broadcast %20 : vector<1x128xf32> to vector<16x128xf32>
    %c0_18 = arith.constant 0 : index
    %c0_19 = arith.constant 0 : index
    %22 = vector.load %arg12[%c0_18, %c0_19] : memref<16x128xf32, #tpu.memory_space<vmem>>, vector<16x128xf32>
    %c0_i32_20 = arith.constant 0 : i32
    %c16_i32 = arith.constant 16 : i32
    %23 = arith.muli %c0_i32_20, %c16_i32 : i32
    %24 = tpu.assume_multiple %23, 16 : i32
    %25 = arith.index_cast %24 : i32 to index
    %c0_21 = arith.constant 0 : index
    %26 = vector.load %arg13[%25, %c0_21] : memref<128x384xf32, #tpu.memory_space<vmem>>, vector<16x384xf32>
    %27 = arith.truncf %22 : vector<16x128xf32> to vector<16x128xbf16>
    %cst_22 = arith.constant dense<0.000000e+00> : vector<16x384xf32>
    %28 = tpu.matmul %27, %18, %cst_22 {dimension_numbers = #tpu.dot_dimension_numbers<[1], [0], [0], [1], [0, 0, 1, 1], [], []>} : vector<16x128xbf16>, vector<128x384xbf16>, vector<16x384xf32> -> vector<16x384xf32>
    %29 = vector.extract_strided_slice %26 {offsets = [0, 0], sizes = [16, 128], strides = [1, 1]} : vector<16x384xf32> to vector<16x128xf32>
    %30 = vector.extract_strided_slice %28 {offsets = [0, 0], sizes = [16, 128], strides = [1, 1]} : vector<16x384xf32> to vector<16x128xf32>
    %31 = arith.addf %29, %30 : vector<16x128xf32>
    %32 = arith.negf %31 : vector<16x128xf32>
    %33 = math.exp %32 : vector<16x128xf32>
    %cst_23 = arith.constant 1.000000e+00 : f32
    %34 = vector.broadcast %cst_23 : f32 to vector<16x128xf32>
    %35 = arith.addf %34, %33 : vector<16x128xf32>
    %36 = arith.divf %34, %35 : vector<16x128xf32>
    %37 = vector.extract_strided_slice %26 {offsets = [0, 128], sizes = [16, 128], strides = [1, 1]} : vector<16x384xf32> to vector<16x128xf32>
    %38 = vector.extract_strided_slice %28 {offsets = [0, 128], sizes = [16, 128], strides = [1, 1]} : vector<16x384xf32> to vector<16x128xf32>
    %39 = arith.addf %37, %38 : vector<16x128xf32>
    %40 = arith.negf %39 : vector<16x128xf32>
    %41 = math.exp %40 : vector<16x128xf32>
    %cst_24 = arith.constant 1.000000e+00 : f32
    %42 = vector.broadcast %cst_24 : f32 to vector<16x128xf32>
    %43 = arith.addf %42, %41 : vector<16x128xf32>
    %44 = arith.divf %42, %43 : vector<16x128xf32>
    %45 = vector.extract_strided_slice %26 {offsets = [0, 256], sizes = [16, 128], strides = [1, 1]} : vector<16x384xf32> to vector<16x128xf32>
    %46 = vector.extract_strided_slice %28 {offsets = [0, 256], sizes = [16, 128], strides = [1, 1]} : vector<16x384xf32> to vector<16x128xf32>
    %47 = arith.addf %46, %21 : vector<16x128xf32>
    %48 = arith.mulf %36, %47 : vector<16x128xf32>
    %49 = arith.addf %45, %48 : vector<16x128xf32>
    %50 = math.tanh %49 : vector<16x128xf32>
    %51 = arith.subf %22, %50 : vector<16x128xf32>
    %52 = arith.mulf %44, %51 : vector<16x128xf32>
    %53 = arith.addf %50, %52 : vector<16x128xf32>
    %54 = arith.truncf %53 : vector<16x128xf32> to vector<16x128xbf16>
    %55 = arith.index_cast %24 : i32 to index
    %c0_25 = arith.constant 0 : index
    %56 = vector.load %arg14[%55, %c0_25] : memref<128x128xbf16, #tpu.memory_space<vmem>>, vector<16x128xbf16>
    tpu.vector_store %arg14[%55, %c0_25], %54 {strides = array<i32>} : memref<128x128xbf16, #tpu.memory_space<vmem>>, vector<16x128xbf16>,
    %c1_i32 = arith.constant 1 : i32
    %c16_i32_26 = arith.constant 16 : i32
    %57 = arith.muli %c1_i32, %c16_i32_26 : i32
    %58 = tpu.assume_multiple %57, 16 : i32
    %59 = arith.index_cast %58 : i32 to index
    %c0_27 = arith.constant 0 : index
    %60 = vector.load %arg13[%59, %c0_27] : memref<128x384xf32, #tpu.memory_space<vmem>>, vector<16x384xf32>
    %61 = arith.truncf %53 : vector<16x128xf32> to vector<16x128xbf16>
    %cst_28 = arith.constant dense<0.000000e+00> : vector<16x384xf32>
    %62 = tpu.matmul %61, %18, %cst_28 {dimension_numbers = #tpu.dot_dimension_numbers<[1], [0], [0], [1], [0, 0, 1, 1], [], []>} : vector<16x128xbf16>, vector<128x384xbf16>, vector<16x384xf32> -> vector<16x384xf32>
    %63 = vector.extract_strided_slice %60 {offsets = [0, 0], sizes = [16, 128], strides = [1, 1]} : vector<16x384xf32> to vector<16x128xf32>
    %64 = vector.extract_strided_slice %62 {offsets = [0, 0], sizes = [16, 128], strides = [1, 1]} : vector<16x384xf32> to vector<16x128xf32>
    %65 = arith.addf %63, %64 : vector<16x128xf32>
    %66 = arith.negf %65 : vector<16x128xf32>
    %67 = math.exp %66 : vector<16x128xf32>
    %cst_29 = arith.constant 1.000000e+00 : f32
    %68 = vector.broadcast %cst_29 : f32 to vector<16x128xf32>
    %69 = arith.addf %68, %67 : vector<16x128xf32>
    %70 = arith.divf %68, %69 : vector<16x128xf32>
    %71 = vector.extract_strided_slice %60 {offsets = [0, 128], sizes = [16, 128], strides = [1, 1]} : vector<16x384xf32> to vector<16x128xf32>
    %72 = vector.extract_strided_slice %62 {offsets = [0, 128], sizes = [16, 128], strides = [1, 1]} : vector<16x384xf32> to vector<16x128xf32>
    %73 = arith.addf %71, %72 : vector<16x128xf32>
    %74 = arith.negf %73 : vector<16x128xf32>
    %75 = math.exp %74 : vector<16x128xf32>
    %cst_30 = arith.constant 1.000000e+00 : f32
    %76 = vector.broadcast %cst_30 : f32 to vector<16x128xf32>
    %77 = arith.addf %76, %75 : vector<16x128xf32>
    %78 = arith.divf %76, %77 : vector<16x128xf32>
    %79 = vector.extract_strided_slice %60 {offsets = [0, 256], sizes = [16, 128], strides = [1, 1]} : vector<16x384xf32> to vector<16x128xf32>
    %80 = vector.extract_strided_slice %62 {offsets = [0, 256], sizes = [16, 128], strides = [1, 1]} : vector<16x384xf32> to vector<16x128xf32>
    %81 = arith.addf %80, %21 : vector<16x128xf32>
    %82 = arith.mulf %70, %81 : vector<16x128xf32>
    %83 = arith.addf %79, %82 : vector<16x128xf32>
    %84 = math.tanh %83 : vector<16x128xf32>
    %85 = arith.subf %53, %84 : vector<16x128xf32>
    %86 = arith.mulf %78, %85 : vector<16x128xf32>
    %87 = arith.addf %84, %86 : vector<16x128xf32>
    %88 = arith.truncf %87 : vector<16x128xf32> to vector<16x128xbf16>
    %89 = arith.index_cast %58 : i32 to index
    %c0_31 = arith.constant 0 : index
    %90 = vector.load %arg14[%89, %c0_31] : memref<128x128xbf16, #tpu.memory_space<vmem>>, vector<16x128xbf16>
    tpu.vector_store %arg14[%89, %c0_31], %88 {strides = array<i32>} : memref<128x128xbf16, #tpu.memory_space<vmem>>, vector<16x128xbf16>,
    %c2_i32 = arith.constant 2 : i32
    %c16_i32_32 = arith.constant 16 : i32
    %91 = arith.muli %c2_i32, %c16_i32_32 : i32
    %92 = tpu.assume_multiple %91, 16 : i32
    %93 = arith.index_cast %92 : i32 to index
    %c0_33 = arith.constant 0 : index
    %94 = vector.load %arg13[%93, %c0_33] : memref<128x384xf32, #tpu.memory_space<vmem>>, vector<16x384xf32>
    %95 = arith.truncf %87 : vector<16x128xf32> to vector<16x128xbf16>
    %cst_34 = arith.constant dense<0.000000e+00> : vector<16x384xf32>
    %96 = tpu.matmul %95, %18, %cst_34 {dimension_numbers = #tpu.dot_dimension_numbers<[1], [0], [0], [1], [0, 0, 1, 1], [], []>} : vector<16x128xbf16>, vector<128x384xbf16>, vector<16x384xf32> -> vector<16x384xf32>
    %97 = vector.extract_strided_slice %94 {offsets = [0, 0], sizes = [16, 128], strides = [1, 1]} : vector<16x384xf32> to vector<16x128xf32>
    %98 = vector.extract_strided_slice %96 {offsets = [0, 0], sizes = [16, 128], strides = [1, 1]} : vector<16x384xf32> to vector<16x128xf32>
    %99 = arith.addf %97, %98 : vector<16x128xf32>
    %100 = arith.negf %99 : vector<16x128xf32>
    %101 = math.exp %100 : vector<16x128xf32>
    %cst_35 = arith.constant 1.000000e+00 : f32
    %102 = vector.broadcast %cst_35 : f32 to vector<16x128xf32>
    %103 = arith.addf %102, %101 : vector<16x128xf32>
    %104 = arith.divf %102, %103 : vector<16x128xf32>
    %105 = vector.extract_strided_slice %94 {offsets = [0, 128], sizes = [16, 128], strides = [1, 1]} : vector<16x384xf32> to vector<16x128xf32>
    %106 = vector.extract_strided_slice %96 {offsets = [0, 128], sizes = [16, 128], strides = [1, 1]} : vector<16x384xf32> to vector<16x128xf32>
    %107 = arith.addf %105, %106 : vector<16x128xf32>
    %108 = arith.negf %107 : vector<16x128xf32>
    %109 = math.exp %108 : vector<16x128xf32>
    %cst_36 = arith.constant 1.000000e+00 : f32
    %110 = vector.broadcast %cst_36 : f32 to vector<16x128xf32>
    %111 = arith.addf %110, %109 : vector<16x128xf32>
    %112 = arith.divf %110, %111 : vector<16x128xf32>
    %113 = vector.extract_strided_slice %94 {offsets = [0, 256], sizes = [16, 128], strides = [1, 1]} : vector<16x384xf32> to vector<16x128xf32>
    %114 = vector.extract_strided_slice %96 {offsets = [0, 256], sizes = [16, 128], strides = [1, 1]} : vector<16x384xf32> to vector<16x128xf32>
    %115 = arith.addf %114, %21 : vector<16x128xf32>
    %116 = arith.mulf %104, %115 : vector<16x128xf32>
    %117 = arith.addf %113, %116 : vector<16x128xf32>
    %118 = math.tanh %117 : vector<16x128xf32>
    %119 = arith.subf %87, %118 : vector<16x128xf32>
    %120 = arith.mulf %112, %119 : vector<16x128xf32>
    %121 = arith.addf %118, %120 : vector<16x128xf32>
    %122 = arith.truncf %121 : vector<16x128xf32> to vector<16x128xbf16>
    %123 = arith.index_cast %92 : i32 to index
    %c0_37 = arith.constant 0 : index
    %124 = vector.load %arg14[%123, %c0_37] : memref<128x128xbf16, #tpu.memory_space<vmem>>, vector<16x128xbf16>
    tpu.vector_store %arg14[%123, %c0_37], %122 {strides = array<i32>} : memref<128x128xbf16, #tpu.memory_space<vmem>>, vector<16x128xbf16>,
    %c3_i32 = arith.constant 3 : i32
    %c16_i32_38 = arith.constant 16 : i32
    %125 = arith.muli %c3_i32, %c16_i32_38 : i32
    %126 = tpu.assume_multiple %125, 16 : i32
    %127 = arith.index_cast %126 : i32 to index
    %c0_39 = arith.constant 0 : index
    %128 = vector.load %arg13[%127, %c0_39] : memref<128x384xf32, #tpu.memory_space<vmem>>, vector<16x384xf32>
    %129 = arith.truncf %121 : vector<16x128xf32> to vector<16x128xbf16>
    %cst_40 = arith.constant dense<0.000000e+00> : vector<16x384xf32>
    %130 = tpu.matmul %129, %18, %cst_40 {dimension_numbers = #tpu.dot_dimension_numbers<[1], [0], [0], [1], [0, 0, 1, 1], [], []>} : vector<16x128xbf16>, vector<128x384xbf16>, vector<16x384xf32> -> vector<16x384xf32>
    %131 = vector.extract_strided_slice %128 {offsets = [0, 0], sizes = [16, 128], strides = [1, 1]} : vector<16x384xf32> to vector<16x128xf32>
    %132 = vector.extract_strided_slice %130 {offsets = [0, 0], sizes = [16, 128], strides = [1, 1]} : vector<16x384xf32> to vector<16x128xf32>
    %133 = arith.addf %131, %132 : vector<16x128xf32>
    %134 = arith.negf %133 : vector<16x128xf32>
    %135 = math.exp %134 : vector<16x128xf32>
    %cst_41 = arith.constant 1.000000e+00 : f32
    %136 = vector.broadcast %cst_41 : f32 to vector<16x128xf32>
    %137 = arith.addf %136, %135 : vector<16x128xf32>
    %138 = arith.divf %136, %137 : vector<16x128xf32>
    %139 = vector.extract_strided_slice %128 {offsets = [0, 128], sizes = [16, 128], strides = [1, 1]} : vector<16x384xf32> to vector<16x128xf32>
    %140 = vector.extract_strided_slice %130 {offsets = [0, 128], sizes = [16, 128], strides = [1, 1]} : vector<16x384xf32> to vector<16x128xf32>
    %141 = arith.addf %139, %140 : vector<16x128xf32>
    %142 = arith.negf %141 : vector<16x128xf32>
    %143 = math.exp %142 : vector<16x128xf32>
    %cst_42 = arith.constant 1.000000e+00 : f32
    %144 = vector.broadcast %cst_42 : f32 to vector<16x128xf32>
    %145 = arith.addf %144, %143 : vector<16x128xf32>
    %146 = arith.divf %144, %145 : vector<16x128xf32>
    %147 = vector.extract_strided_slice %128 {offsets = [0, 256], sizes = [16, 128], strides = [1, 1]} : vector<16x384xf32> to vector<16x128xf32>
    %148 = vector.extract_strided_slice %130 {offsets = [0, 256], sizes = [16, 128], strides = [1, 1]} : vector<16x384xf32> to vector<16x128xf32>
    %149 = arith.addf %148, %21 : vector<16x128xf32>
    %150 = arith.mulf %138, %149 : vector<16x128xf32>
    %151 = arith.addf %147, %150 : vector<16x128xf32>
    %152 = math.tanh %151 : vector<16x128xf32>
    %153 = arith.subf %121, %152 : vector<16x128xf32>
    %154 = arith.mulf %146, %153 : vector<16x128xf32>
    %155 = arith.addf %152, %154 : vector<16x128xf32>
    %156 = arith.truncf %155 : vector<16x128xf32> to vector<16x128xbf16>
    %157 = arith.index_cast %126 : i32 to index
    %c0_43 = arith.constant 0 : index
    %158 = vector.load %arg14[%157, %c0_43] : memref<128x128xbf16, #tpu.memory_space<vmem>>, vector<16x128xbf16>
    tpu.vector_store %arg14[%157, %c0_43], %156 {strides = array<i32>} : memref<128x128xbf16, #tpu.memory_space<vmem>>, vector<16x128xbf16>,
    %c4_i32 = arith.constant 4 : i32
    %c16_i32_44 = arith.constant 16 : i32
    %159 = arith.muli %c4_i32, %c16_i32_44 : i32
    %160 = tpu.assume_multiple %159, 16 : i32
    %161 = arith.index_cast %160 : i32 to index
    %c0_45 = arith.constant 0 : index
    %162 = vector.load %arg13[%161, %c0_45] : memref<128x384xf32, #tpu.memory_space<vmem>>, vector<16x384xf32>
    %163 = arith.truncf %155 : vector<16x128xf32> to vector<16x128xbf16>
    %cst_46 = arith.constant dense<0.000000e+00> : vector<16x384xf32>
    %164 = tpu.matmul %163, %18, %cst_46 {dimension_numbers = #tpu.dot_dimension_numbers<[1], [0], [0], [1], [0, 0, 1, 1], [], []>} : vector<16x128xbf16>, vector<128x384xbf16>, vector<16x384xf32> -> vector<16x384xf32>
    %165 = vector.extract_strided_slice %162 {offsets = [0, 0], sizes = [16, 128], strides = [1, 1]} : vector<16x384xf32> to vector<16x128xf32>
    %166 = vector.extract_strided_slice %164 {offsets = [0, 0], sizes = [16, 128], strides = [1, 1]} : vector<16x384xf32> to vector<16x128xf32>
    %167 = arith.addf %165, %166 : vector<16x128xf32>
    %168 = arith.negf %167 : vector<16x128xf32>
    %169 = math.exp %168 : vector<16x128xf32>
    %cst_47 = arith.constant 1.000000e+00 : f32
    %170 = vector.broadcast %cst_47 : f32 to vector<16x128xf32>
    %171 = arith.addf %170, %169 : vector<16x128xf32>
    %172 = arith.divf %170, %171 : vector<16x128xf32>
    %173 = vector.extract_strided_slice %162 {offsets = [0, 128], sizes = [16, 128], strides = [1, 1]} : vector<16x384xf32> to vector<16x128xf32>
    %174 = vector.extract_strided_slice %164 {offsets = [0, 128], sizes = [16, 128], strides = [1, 1]} : vector<16x384xf32> to vector<16x128xf32>
    %175 = arith.addf %173, %174 : vector<16x128xf32>
    %176 = arith.negf %175 : vector<16x128xf32>
    %177 = math.exp %176 : vector<16x128xf32>
    %cst_48 = arith.constant 1.000000e+00 : f32
    %178 = vector.broadcast %cst_48 : f32 to vector<16x128xf32>
    %179 = arith.addf %178, %177 : vector<16x128xf32>
    %180 = arith.divf %178, %179 : vector<16x128xf32>
    %181 = vector.extract_strided_slice %162 {offsets = [0, 256], sizes = [16, 128], strides = [1, 1]} : vector<16x384xf32> to vector<16x128xf32>
    %182 = vector.extract_strided_slice %164 {offsets = [0, 256], sizes = [16, 128], strides = [1, 1]} : vector<16x384xf32> to vector<16x128xf32>
    %183 = arith.addf %182, %21 : vector<16x128xf32>
    %184 = arith.mulf %172, %183 : vector<16x128xf32>
    %185 = arith.addf %181, %184 : vector<16x128xf32>
    %186 = math.tanh %185 : vector<16x128xf32>
    %187 = arith.subf %155, %186 : vector<16x128xf32>
    %188 = arith.mulf %180, %187 : vector<16x128xf32>
    %189 = arith.addf %186, %188 : vector<16x128xf32>
    %190 = arith.truncf %189 : vector<16x128xf32> to vector<16x128xbf16>
    %191 = arith.index_cast %160 : i32 to index
    %c0_49 = arith.constant 0 : index
    %192 = vector.load %arg14[%191, %c0_49] : memref<128x128xbf16, #tpu.memory_space<vmem>>, vector<16x128xbf16>
    tpu.vector_store %arg14[%191, %c0_49], %190 {strides = array<i32>} : memref<128x128xbf16, #tpu.memory_space<vmem>>, vector<16x128xbf16>,
    %c5_i32 = arith.constant 5 : i32
    %c16_i32_50 = arith.constant 16 : i32
    %193 = arith.muli %c5_i32, %c16_i32_50 : i32
    %194 = tpu.assume_multiple %193, 16 : i32
    %195 = arith.index_cast %194 : i32 to index
    %c0_51 = arith.constant 0 : index
    %196 = vector.load %arg13[%195, %c0_51] : memref<128x384xf32, #tpu.memory_space<vmem>>, vector<16x384xf32>
    %197 = arith.truncf %189 : vector<16x128xf32> to vector<16x128xbf16>
    %cst_52 = arith.constant dense<0.000000e+00> : vector<16x384xf32>
    %198 = tpu.matmul %197, %18, %cst_52 {dimension_numbers = #tpu.dot_dimension_numbers<[1], [0], [0], [1], [0, 0, 1, 1], [], []>} : vector<16x128xbf16>, vector<128x384xbf16>, vector<16x384xf32> -> vector<16x384xf32>
    %199 = vector.extract_strided_slice %196 {offsets = [0, 0], sizes = [16, 128], strides = [1, 1]} : vector<16x384xf32> to vector<16x128xf32>
    %200 = vector.extract_strided_slice %198 {offsets = [0, 0], sizes = [16, 128], strides = [1, 1]} : vector<16x384xf32> to vector<16x128xf32>
    %201 = arith.addf %199, %200 : vector<16x128xf32>
    %202 = arith.negf %201 : vector<16x128xf32>
    %203 = math.exp %202 : vector<16x128xf32>
    %cst_53 = arith.constant 1.000000e+00 : f32
    %204 = vector.broadcast %cst_53 : f32 to vector<16x128xf32>
    %205 = arith.addf %204, %203 : vector<16x128xf32>
    %206 = arith.divf %204, %205 : vector<16x128xf32>
    %207 = vector.extract_strided_slice %196 {offsets = [0, 128], sizes = [16, 128], strides = [1, 1]} : vector<16x384xf32> to vector<16x128xf32>
    %208 = vector.extract_strided_slice %198 {offsets = [0, 128], sizes = [16, 128], strides = [1, 1]} : vector<16x384xf32> to vector<16x128xf32>
    %209 = arith.addf %207, %208 : vector<16x128xf32>
    %210 = arith.negf %209 : vector<16x128xf32>
    %211 = math.exp %210 : vector<16x128xf32>
    %cst_54 = arith.constant 1.000000e+00 : f32
    %212 = vector.broadcast %cst_54 : f32 to vector<16x128xf32>
    %213 = arith.addf %212, %211 : vector<16x128xf32>
    %214 = arith.divf %212, %213 : vector<16x128xf32>
    %215 = vector.extract_strided_slice %196 {offsets = [0, 256], sizes = [16, 128], strides = [1, 1]} : vector<16x384xf32> to vector<16x128xf32>
    %216 = vector.extract_strided_slice %198 {offsets = [0, 256], sizes = [16, 128], strides = [1, 1]} : vector<16x384xf32> to vector<16x128xf32>
    %217 = arith.addf %216, %21 : vector<16x128xf32>
    %218 = arith.mulf %206, %217 : vector<16x128xf32>
    %219 = arith.addf %215, %218 : vector<16x128xf32>
    %220 = math.tanh %219 : vector<16x128xf32>
    %221 = arith.subf %189, %220 : vector<16x128xf32>
    %222 = arith.mulf %214, %221 : vector<16x128xf32>
    %223 = arith.addf %220, %222 : vector<16x128xf32>
    %224 = arith.truncf %223 : vector<16x128xf32> to vector<16x128xbf16>
    %225 = arith.index_cast %194 : i32 to index
    %c0_55 = arith.constant 0 : index
    %226 = vector.load %arg14[%225, %c0_55] : memref<128x128xbf16, #tpu.memory_space<vmem>>, vector<16x128xbf16>
    tpu.vector_store %arg14[%225, %c0_55], %224 {strides = array<i32>} : memref<128x128xbf16, #tpu.memory_space<vmem>>, vector<16x128xbf16>,
    %c6_i32 = arith.constant 6 : i32
    %c16_i32_56 = arith.constant 16 : i32
    %227 = arith.muli %c6_i32, %c16_i32_56 : i32
    %228 = tpu.assume_multiple %227, 16 : i32
    %229 = arith.index_cast %228 : i32 to index
    %c0_57 = arith.constant 0 : index
    %230 = vector.load %arg13[%229, %c0_57] : memref<128x384xf32, #tpu.memory_space<vmem>>, vector<16x384xf32>
    %231 = arith.truncf %223 : vector<16x128xf32> to vector<16x128xbf16>
    %cst_58 = arith.constant dense<0.000000e+00> : vector<16x384xf32>
    %232 = tpu.matmul %231, %18, %cst_58 {dimension_numbers = #tpu.dot_dimension_numbers<[1], [0], [0], [1], [0, 0, 1, 1], [], []>} : vector<16x128xbf16>, vector<128x384xbf16>, vector<16x384xf32> -> vector<16x384xf32>
    %233 = vector.extract_strided_slice %230 {offsets = [0, 0], sizes = [16, 128], strides = [1, 1]} : vector<16x384xf32> to vector<16x128xf32>
    %234 = vector.extract_strided_slice %232 {offsets = [0, 0], sizes = [16, 128], strides = [1, 1]} : vector<16x384xf32> to vector<16x128xf32>
    %235 = arith.addf %233, %234 : vector<16x128xf32>
    %236 = arith.negf %235 : vector<16x128xf32>
    %237 = math.exp %236 : vector<16x128xf32>
    %cst_59 = arith.constant 1.000000e+00 : f32
    %238 = vector.broadcast %cst_59 : f32 to vector<16x128xf32>
    %239 = arith.addf %238, %237 : vector<16x128xf32>
    %240 = arith.divf %238, %239 : vector<16x128xf32>
    %241 = vector.extract_strided_slice %230 {offsets = [0, 128], sizes = [16, 128], strides = [1, 1]} : vector<16x384xf32> to vector<16x128xf32>
    %242 = vector.extract_strided_slice %232 {offsets = [0, 128], sizes = [16, 128], strides = [1, 1]} : vector<16x384xf32> to vector<16x128xf32>
    %243 = arith.addf %241, %242 : vector<16x128xf32>
    %244 = arith.negf %243 : vector<16x128xf32>
    %245 = math.exp %244 : vector<16x128xf32>
    %cst_60 = arith.constant 1.000000e+00 : f32
    %246 = vector.broadcast %cst_60 : f32 to vector<16x128xf32>
    %247 = arith.addf %246, %245 : vector<16x128xf32>
    %248 = arith.divf %246, %247 : vector<16x128xf32>
    %249 = vector.extract_strided_slice %230 {offsets = [0, 256], sizes = [16, 128], strides = [1, 1]} : vector<16x384xf32> to vector<16x128xf32>
    %250 = vector.extract_strided_slice %232 {offsets = [0, 256], sizes = [16, 128], strides = [1, 1]} : vector<16x384xf32> to vector<16x128xf32>
    %251 = arith.addf %250, %21 : vector<16x128xf32>
    %252 = arith.mulf %240, %251 : vector<16x128xf32>
    %253 = arith.addf %249, %252 : vector<16x128xf32>
    %254 = math.tanh %253 : vector<16x128xf32>
    %255 = arith.subf %223, %254 : vector<16x128xf32>
    %256 = arith.mulf %248, %255 : vector<16x128xf32>
    %257 = arith.addf %254, %256 : vector<16x128xf32>
    %258 = arith.truncf %257 : vector<16x128xf32> to vector<16x128xbf16>
    %259 = arith.index_cast %228 : i32 to index
    %c0_61 = arith.constant 0 : index
    %260 = vector.load %arg14[%259, %c0_61] : memref<128x128xbf16, #tpu.memory_space<vmem>>, vector<16x128xbf16>
    tpu.vector_store %arg14[%259, %c0_61], %258 {strides = array<i32>} : memref<128x128xbf16, #tpu.memory_space<vmem>>, vector<16x128xbf16>,
    %c7_i32 = arith.constant 7 : i32
    %c16_i32_62 = arith.constant 16 : i32
    %261 = arith.muli %c7_i32, %c16_i32_62 : i32
    %262 = tpu.assume_multiple %261, 16 : i32
    %263 = arith.index_cast %262 : i32 to index
    %c0_63 = arith.constant 0 : index
    %264 = vector.load %arg13[%263, %c0_63] : memref<128x384xf32, #tpu.memory_space<vmem>>, vector<16x384xf32>
    %265 = arith.truncf %257 : vector<16x128xf32> to vector<16x128xbf16>
    %cst_64 = arith.constant dense<0.000000e+00> : vector<16x384xf32>
    %266 = tpu.matmul %265, %18, %cst_64 {dimension_numbers = #tpu.dot_dimension_numbers<[1], [0], [0], [1], [0, 0, 1, 1], [], []>} : vector<16x128xbf16>, vector<128x384xbf16>, vector<16x384xf32> -> vector<16x384xf32>
    %267 = vector.extract_strided_slice %264 {offsets = [0, 0], sizes = [16, 128], strides = [1, 1]} : vector<16x384xf32> to vector<16x128xf32>
    %268 = vector.extract_strided_slice %266 {offsets = [0, 0], sizes = [16, 128], strides = [1, 1]} : vector<16x384xf32> to vector<16x128xf32>
    %269 = arith.addf %267, %268 : vector<16x128xf32>
    %270 = arith.negf %269 : vector<16x128xf32>
    %271 = math.exp %270 : vector<16x128xf32>
    %cst_65 = arith.constant 1.000000e+00 : f32
    %272 = vector.broadcast %cst_65 : f32 to vector<16x128xf32>
    %273 = arith.addf %272, %271 : vector<16x128xf32>
    %274 = arith.divf %272, %273 : vector<16x128xf32>
    %275 = vector.extract_strided_slice %264 {offsets = [0, 128], sizes = [16, 128], strides = [1, 1]} : vector<16x384xf32> to vector<16x128xf32>
    %276 = vector.extract_strided_slice %266 {offsets = [0, 128], sizes = [16, 128], strides = [1, 1]} : vector<16x384xf32> to vector<16x128xf32>
    %277 = arith.addf %275, %276 : vector<16x128xf32>
    %278 = arith.negf %277 : vector<16x128xf32>
    %279 = math.exp %278 : vector<16x128xf32>
    %cst_66 = arith.constant 1.000000e+00 : f32
    %280 = vector.broadcast %cst_66 : f32 to vector<16x128xf32>
    %281 = arith.addf %280, %279 : vector<16x128xf32>
    %282 = arith.divf %280, %281 : vector<16x128xf32>
    %283 = vector.extract_strided_slice %264 {offsets = [0, 256], sizes = [16, 128], strides = [1, 1]} : vector<16x384xf32> to vector<16x128xf32>
    %284 = vector.extract_strided_slice %266 {offsets = [0, 256], sizes = [16, 128], strides = [1, 1]} : vector<16x384xf32> to vector<16x128xf32>
    %285 = arith.addf %284, %21 : vector<16x128xf32>
    %286 = arith.mulf %274, %285 : vector<16x128xf32>
    %287 = arith.addf %283, %286 : vector<16x128xf32>
    %288 = math.tanh %287 : vector<16x128xf32>
    %289 = arith.subf %257, %288 : vector<16x128xf32>
    %290 = arith.mulf %282, %289 : vector<16x128xf32>
    %291 = arith.addf %288, %290 : vector<16x128xf32>
    %292 = arith.truncf %291 : vector<16x128xf32> to vector<16x128xbf16>
    %293 = arith.index_cast %262 : i32 to index
    %c0_67 = arith.constant 0 : index
    %294 = vector.load %arg14[%293, %c0_67] : memref<128x128xbf16, #tpu.memory_space<vmem>>, vector<16x128xbf16>
    tpu.vector_store %arg14[%293, %c0_67], %292 {strides = array<i32>} : memref<128x128xbf16, #tpu.memory_space<vmem>>, vector<16x128xbf16>,
    %c8_i32 = arith.constant 8 : i32
    %c0_68 = arith.constant 0 : index
    %c0_69 = arith.constant 0 : index
    %295 = vector.load %arg12[%c0_68, %c0_69] : memref<16x128xf32, #tpu.memory_space<vmem>>, vector<16x128xf32>
    tpu.vector_store %arg12[%c0_68, %c0_69], %291 {strides = array<i32>} : memref<16x128xf32, #tpu.memory_space<vmem>>, vector<16x128xf32>,
    %c0_70 = arith.constant 0 : index
    %c0_71 = arith.constant 0 : index
    %296 = vector.load %arg14[%c0_70, %c0_71] : memref<128x128xbf16, #tpu.memory_space<vmem>>, vector<128x128xbf16>
    %c0_72 = arith.constant 0 : index
    %c0_73 = arith.constant 0 : index
    %297 = vector.load %arg9[%c0_72, %c0_73] : memref<128x128xbf16, #tpu.memory_space<vmem>>, vector<128x128xbf16>
    %cst_74 = arith.constant dense<0.000000e+00> : vector<128x128xf32>
    %298 = tpu.matmul %296, %297, %cst_74 {dimension_numbers = #tpu.dot_dimension_numbers<[1], [0], [0], [1], [0, 0, 1, 1], [], []>} : vector<128x128xbf16>, vector<128x128xbf16>, vector<128x128xf32> -> vector<128x128xf32>
    %c0_75 = arith.constant 0 : index
    %c0_76 = arith.constant 0 : index
    %299 = vector.load %arg10[%c0_75, %c0_76] : memref<1x128xf32, #tpu.memory_space<vmem>>, vector<1x128xf32>
    %300 = vector.broadcast %299 : vector<1x128xf32> to vector<128x128xf32>
    %301 = arith.addf %298, %300 : vector<128x128xf32>
    %c0_77 = arith.constant 0 : index
    %c0_78 = arith.constant 0 : index
    %302 = vector.load %arg11[%c0_77, %c0_78] : memref<128x128xf32, #tpu.memory_space<vmem>>, vector<128x128xf32>
    tpu.vector_store %arg11[%c0_77, %c0_78], %301 {strides = array<i32>} : memref<128x128xf32, #tpu.memory_space<vmem>>, vector<128x128xf32>,
    return
  }
  func.func @transform_0(%arg0: i32) -> (i32, i32) {
    %c0_i32 = arith.constant 0 : i32
    %c0_i32_0 = arith.constant 0 : i32
    return %arg0, %c0_i32 : i32, i32
  }
  func.func @transform_1(%arg0: i32) -> (i32, i32) {
    %c0_i32 = arith.constant 0 : i32
    %c0_i32_0 = arith.constant 0 : i32
    %c0_i32_1 = arith.constant 0 : i32
    return %c0_i32, %c0_i32_0 : i32, i32
  }
  func.func @transform_2(%arg0: i32) -> (i32, i32) {
    %c0_i32 = arith.constant 0 : i32
    %c0_i32_0 = arith.constant 0 : i32
    %c0_i32_1 = arith.constant 0 : i32
    return %c0_i32, %c0_i32_0 : i32, i32
  }
  func.func @transform_3(%arg0: i32) -> (i32, i32) {
    %c0_i32 = arith.constant 0 : i32
    %c0_i32_0 = arith.constant 0 : i32
    %c0_i32_1 = arith.constant 0 : i32
    return %c0_i32, %c0_i32_0 : i32, i32
  }
  func.func @transform_4(%arg0: i32) -> (i32, i32) {
    %c0_i32 = arith.constant 0 : i32
    %c0_i32_0 = arith.constant 0 : i32
    %c0_i32_1 = arith.constant 0 : i32
    return %c0_i32, %c0_i32_0 : i32, i32
  }
  func.func @transform_5(%arg0: i32) -> (i32, i32) {
    %c0_i32 = arith.constant 0 : i32
    %c0_i32_0 = arith.constant 0 : i32
    %c0_i32_1 = arith.constant 0 : i32
    return %c0_i32, %c0_i32_0 : i32, i32
  }
  func.func @transform_6(%arg0: i32) -> (i32, i32) {
    %c0_i32 = arith.constant 0 : i32
    %c0_i32_0 = arith.constant 0 : i32
    %c0_i32_1 = arith.constant 0 : i32
    return %c0_i32, %c0_i32_0 : i32, i32
  }
  func.func @transform_7(%arg0: i32) -> (i32, i32) {
    %c0_i32 = arith.constant 0 : i32
    %c0_i32_0 = arith.constant 0 : i32
    %c0_i32_1 = arith.constant 0 : i32
    return %c0_i32, %c0_i32_0 : i32, i32
  }
  func.func @transform_8(%arg0: i32) -> (i32, i32) {
    %c0_i32 = arith.constant 0 : i32
    %c0_i32_0 = arith.constant 0 : i32
    %c0_i32_1 = arith.constant 0 : i32
    return %c0_i32, %c0_i32_0 : i32, i32
  }
  func.func @transform_9(%arg0: i32) -> (i32, i32) {
    %c0_i32 = arith.constant 0 : i32
    %c0_i32_0 = arith.constant 0 : i32
    %c0_i32_1 = arith.constant 0 : i32
    return %c0_i32, %c0_i32_0 : i32, i32
  }
  func.func @transform_10(%arg0: i32) -> (i32, i32) {
    %c0_i32 = arith.constant 0 : i32
    %c0_i32_0 = arith.constant 0 : i32
    return %arg0, %c0_i32 : i32, i32
  }
  func.func @transform_11(%arg0: i32) -> (i32, i32) {
    %c0_i32 = arith.constant 0 : i32
    %c0_i32_0 = arith.constant 0 : i32
    %c0_i32_1 = arith.constant 0 : i32
    return %c0_i32, %c0_i32_0 : i32, i32
  }
}

</mosaic_0001>

<bundles_post_ra>
// kernel: tpu_custom_call.1
= control target key start
LH: loop header
LB: loop body
LE: loop exit
PB: predicated region body
PF: predicated region fallthrough
CT: control target
= control target key end

     0   :  { %17 = vsyncpa [#allocation5], 0  ;;  %s4033_s0 = inlined_call_operand.vmem [shape: bf16[128,64], index: 0, kind: input, shape index: {}]   ;;  %s4034_s1 = inlined_call_operand.vmem [shape: f32[16,128], index: 1, kind: input, shape index: {}]   ;;  %s4035_s2 = inlined_call_operand.vmem [shape: bf16[64,128], index: 2, kind: input, shape index: {}]   ;;  %s4036_s3 = inlined_call_operand.vmem [shape: f32[1,128], index: 3, kind: input, shape index: {}]   ;;  %s4037_s4 = inlined_call_operand.hbm [shape: bf16[128,384], index: 4, kind: input, shape index: {}]   ;;  %s4038_s5 = inlined_call_operand.vmem [shape: f32[1,384], index: 5, kind: input, shape index: {}]   ;;  %s4039_s6 = inlined_call_operand.hbm [shape: bf16[128,384], index: 6, kind: input, shape index: {}]   ;;  %s4040_s7 = inlined_call_operand.vmem [shape: f32[1,128], index: 7, kind: input, shape index: {}]   ;;  %s4041_s8 = inlined_call_operand.vmem [shape: bf16[128,128], index: 8, kind: input, shape index: {}]   ;;  %s4042_s9 = inlined_call_operand.vmem [shape: f32[1,128], index: 9, kind: input, shape index: {}]   ;;  %s4043_s10 = inlined_call_operand.hbm [shape: f32[128,128], index: 10, kind: output, shape index: {0}]   ;;  %s4044_s11 = inlined_call_operand.hbm [shape: f32[16,128], index: 11, kind: output, shape index: {1}]  }
   0x1   :  { %18 = vsyncpa [#allocation8], 0 }
   0x2   :  { %19 = vsyncpa [#allocation6], 0 }
   0x3   :  { %20 = vsyncpa [#allocation11], 0  ;;  %s3175_s17 = smov [#allocation4]   ;;  %s3079_s21 = scalar_lea.hbm %s4037_s4, 3072 }
   0x4   :  { %s34_s18 = sshll.u32 %s3175_s17, 4  ;;  %p3080_p0 = scmp.ne.s32.totalorder %s4037_s4, %s3079_s21  ;;  %s35_s18 = int_to_ptr.vmem [resolvable:$true] %s34_s18 }
   0x5   :  { %p3083_p1 = scmp.lt.u32.totalorder %s3079_s21, %s4037_s4 }
   0x7   :  { %p3085_p2 = pnand %p3083_p1, %p3080_p0 }
   0x9   :  { %3088 = shalt.err (!%p3085_p2)
}
   0xa   :  { %s3089_s26 = scalar_lea.vmem %s35_s18, 3072  ;;  %p3094_p4 = scmp.lt.s32.totalorder %s35_s18, %s35_s18 }
   0xb   :  { %p3090_p3 = scmp.ne.s32.totalorder %s35_s18, %s3089_s26  ;;  %p3095_p5 = scmp.lt.s32.totalorder %s3089_s26, %s3089_s26 }
   0xd   :  { %p3096_p6 = por %p3095_p5, %p3094_p4 }
   0xf   :  { %p3097_p7 = pnand %p3096_p6, %p3090_p3 }
  0x11   :  { %3100 = shalt.err (!%p3097_p7)
}
  0x12   :  { %s3176_s27 = smov 192   ;;  %s3177_s28 = smov 12  }
  0x13   :  { %40 = dma.hbm_to_vmem [thread:$0]  %s4037_s4, 3072, %s35_s18, [#allocation5], %s3176_s27, %s3176_s27, %s3177_s28  }
  0x14   :  { %s3178_s12 = smov [#allocation7]   ;;  %s3101_s16 = scalar_lea.hbm %s4039_s6, 3072 }
  0x15   :  { %s48_s13 = sshll.u32 %s3178_s12, 4  ;;  %p3102_p8 = scmp.ne.s32.totalorder %s4039_s6, %s3101_s16  ;;  %s49_s13 = int_to_ptr.vmem [resolvable:$true] %s48_s13 }
  0x16   :  { %p3105_p9 = scmp.lt.u32.totalorder %s3101_s16, %s4039_s6 }
  0x18   :  { %p3107_p10 = pnand %p3105_p9, %p3102_p8 }
  0x1a   :  { %3110 = shalt.err (!%p3107_p10)
}
  0x1b   :  { %s3111_s22 = scalar_lea.vmem %s49_s13, 3072  ;;  %p3116_p12 = scmp.lt.s32.totalorder %s49_s13, %s49_s13 }
  0x1c   :  { %p3112_p11 = scmp.ne.s32.totalorder %s49_s13, %s3111_s22  ;;  %p3117_p13 = scmp.lt.s32.totalorder %s3111_s22, %s3111_s22 }
  0x1e   :  { %p3118_p0 = por %p3117_p13, %p3116_p12 }
  0x20   :  { %p3119_p1 = pnand %p3118_p0, %p3112_p11 }
  0x22   :  { %3122 = shalt.err (!%p3119_p1)
}
  0x23   :  { %54 = dma.hbm_to_vmem [thread:$0]  %s4039_s6, 3072, %s49_s13, [#allocation8], %s3176_s27, %s3176_s27, %s3177_s28  }
  0x24   :  { %3167 = dma.done.wait [#allocation5], 3072  }
  0x25   :  { %3168 = vsyncadd [#allocation5], 4294964224 }
  0x26   :  { %3169 = dma.done.wait [#allocation8], 3072  }
  0x27   :  { %3170 = vsyncadd [#allocation8], 4294964224  ;;  %v2810_v0 = vld [vmem:[%s4035_s2] sm:$0xff]   ;;  %v2811_v1 = vld [vmem:[%s4035_s2 + $0x8] sm:$0xff]   ;;  %vm171_vm0 = vcmask 523264   ;;  %v4045_v36 = vmov 0  }
  0x28   :  { %2487 = vmatprep.subr.bf16.mxu1 %v2810_v0  ;;  %v2812_v2 = vld [vmem:[%s4035_s2 + $0x10] sm:$0xff]   ;;  %v2814_v3 = vld [vmem:[%s4033_s0] sm:$0xff]   ;;  %v2813_v4 = vld [vmem:[%s4035_s2 + $0x18] sm:$0xff]   ;;  %v4047_v38 = vmov 0.0   ;;  %vm3181_vm1 = vmmov 0  }
  0x29   :  { %2488 = vmatpush3.bf16.msra.mxu1 %v2810_v0  ;;  %2495 = vmatprep.mubr.msk.bf16.mxu1 %vm171_vm0, %v2814_v3  ;;  %v2815_v5 = vld [vmem:[%s4033_s0 + $0x8] sm:$0xff]   ;;  %v2816_v6 = vld [vmem:[%s4033_s0 + $0x10] sm:$0xff]   ;;  %v2833_v12 = vld [vmem:[#allocation4 + $0x38] ss:$12 sps:$4 sm:$0xff]  }
  0x2a   :  { %2489 = vmatprep.subr.bf16.mxu1 %v2811_v1  ;;  %v2824_v7 = vld [vmem:[#allocation4 + $0x4] ss:$12 sps:$4 sm:$0xff]   ;;  %v2825_v8 = vld [vmem:[#allocation4 + $0x8] ss:$12 sps:$4 sm:$0xff]   ;;  %v2822_v9 = vld [vmem:[#allocation4] ss:$12 sps:$4 sm:$0xff]  }
  0x2b   :  { %v2828_v10 = vld [vmem:[#allocation4 + $0x1c] ss:$12 sps:$4 sm:$0xff]   ;;  %2511 = vmatprep.subr.bf16.mxu0 %v2825_v8  ;;  %v2829_v11 = vld [vmem:[#allocation4 + $0x20] ss:$12 sps:$4 sm:$0xff]   ;;  %v2826_v13 = vld [vmem:[#allocation4 + $0x18] ss:$12 sps:$4 sm:$0xff]  }
  0x2c   :  { %2512 = vmatpush3.bf16.msra.mxu0 %v2825_v8  ;;  %v2832_v14 = vld [vmem:[#allocation4 + $0x34] ss:$12 sps:$4 sm:$0xff]   ;;  %v2817_v15 = vld [vmem:[%s4033_s0 + $0x18] sm:$0xff]   ;;  %v2840_v22 = vld [vmem:[#allocation4 + $0x64] ss:$12 sps:$4 sm:$0xff]  }
  0x2d   :  { %2490 = vmatpush3.bf16.msra.mxu1 %v2811_v1  ;;  %2513 = vmatprep.subr.bf16.mxu0 %v2829_v11  ;;  %v2818_v16 = vld [vmem:[%s4033_s0 + $0x20] sm:$0xff]   ;;  %v2837_v17 = vld [vmem:[#allocation4 + $0x50] ss:$12 sps:$4 sm:$0xff]   ;;  %v2836_v19 = vld [vmem:[#allocation4 + $0x4c] ss:$12 sps:$4 sm:$0xff]  }
  0x2e   :  { %2491 = vmatprep.subr.bf16.mxu1 %v2812_v2  ;;  %v2830_v18 = vld [vmem:[#allocation4 + $0x30] ss:$12 sps:$4 sm:$0xff]   ;;  %v2834_v20 = vld [vmem:[#allocation4 + $0x48] ss:$12 sps:$4 sm:$0xff]   ;;  %v2845_v24 = vld [vmem:[#allocation4 + $0x80] ss:$12 sps:$4 sm:$0xff]  }
  0x2f   :  { %v2841_v21 = vld [vmem:[#allocation4 + $0x68] ss:$12 sps:$4 sm:$0xff]   ;;  %v2838_v26 = vld [vmem:[#allocation4 + $0x60] ss:$12 sps:$4 sm:$0xff]   ;;  %v2842_v28 = vld [vmem:[#allocation4 + $0x78] ss:$12 sps:$4 sm:$0xff]  }
  0x30   :  { %2514 = vmatpush3.bf16.msra.mxu0 %v2829_v11  ;;  %v2819_v23 = vld [vmem:[%s4033_s0 + $0x28] sm:$0xff]   ;;  %v2820_v25 = vld [vmem:[%s4033_s0 + $0x30] sm:$0xff]   ;;  %v2821_v29 = vld [vmem:[%s4033_s0 + $0x38] sm:$0xff]  }
  0x31   :  { %2492 = vmatpush3.bf16.msra.mxu1 %v2812_v2  ;;  %2515 = vmatprep.subr.bf16.mxu0 %v2833_v12  ;;  %v2844_v27 = vld [vmem:[#allocation4 + $0x7c] ss:$12 sps:$4 sm:$0xff]   ;;  %v2848_v30 = vld [vmem:[#allocation4 + $0x94] ss:$12 sps:$4 sm:$0xff]   ;;  %v2849_v32 = vld [vmem:[#allocation4 + $0x98] ss:$12 sps:$4 sm:$0xff]  }
  0x32   :  { %2493 = vmatprep.subr.bf16.mxu1 %v2813_v4  ;;  %v2846_v31 = vld [vmem:[#allocation4 + $0x90] ss:$12 sps:$4 sm:$0xff]   ;;  %v2852_v33 = vld [vmem:[#allocation4 + $0xac] ss:$12 sps:$4 sm:$0xff]   ;;  %v2850_v34 = vld [vmem:[#allocation4 + $0xa8] ss:$12 sps:$4 sm:$0xff]  }
  0x33   :  { %v2853_v35 = vld [vmem:[#allocation4 + $0xb0] ss:$12 sps:$4 sm:$0xff]   ;;  %v3322_v39 = vld [vmem:[%s4036_s3] ss:$0 sm:$0xff]  ;;  %v3333_v59 = vld [vmem:[#allocation7 + $0x8] ss:$12 sps:$4 sm:$0xff]  }
  0x34   :  { %2516 = vmatpush3.bf16.msra.mxu0 %v2833_v12  ;;  %v3315_v37 = vld [vmem:[#allocation7 + $0x4] ss:$12 sps:$4 sm:$0xff]   ;;  %v3328_v53 = vld [vmem:[#allocation7] ss:$12 sps:$4 sm:$0xff]   ;;  %v3330_v56 = vld [vmem:[#allocation7 + $0x1c] ss:$12 sps:$4 sm:$0xff]  }
  0x35   :  { %2494 = vmatpush3.bf16.msra.mxu1 %v2813_v4  ;;  %2517 = vmatprep.subr.bf16.mxu0 %v2837_v17  ;;  %v3338_v1 = vld [vmem:[#allocation7 + $0x18] ss:$12 sps:$4 sm:$0xff]   ;;  %v3343_v4 = vld [vmem:[#allocation7 + $0x34] ss:$12 sps:$4 sm:$0xff]   ;;  %v3353_v11 = vld [vmem:[#allocation7 + $0x30] ss:$12 sps:$4 sm:$0xff]  }
  0x36   :  { %494 = vmatprep.subr.bf16.mxu1 %v2824_v7 }
  0x38   :  { %2496 = vmatmul.mubr.msk.bf16.vlgmr.msra.gmra.mrb[0].mxu1 %vm171_vm0, %v2815_v5  ;;  %2518 = vmatpush3.bf16.msra.mxu0 %v2837_v17 }
  0x39   :  { %2499 = vmatprep.mubr.msk.bf16.mxu1 %vm171_vm0, %v2816_v6  ;;  %495 = vmatpush1.bf16.msra.mxu1 %v2822_v9  ;;  %v3346_v6 = vld [vmem:[#allocation7 + $0x20] ss:$12 sps:$4 sm:$0xff]  }
  0x3a   :  { %496 = vmatprep.subr.bf16.mxu1 %v2828_v10  ;;  %2519 = vmatprep.subr.bf16.mxu0 %v2841_v21 }
  0x3c   :  { %2520 = vmatpush3.bf16.msra.mxu0 %v2841_v21 }
  0x3d   :  { %497 = vmatpush1.bf16.msra.mxu1 %v2826_v13  ;;  %2521 = vmatprep.subr.bf16.mxu0 %v2845_v24 }
  0x3e   :  { %498 = vmatprep.subr.bf16.mxu1 %v2832_v14  ;;  %v3356_v14 = vld [vmem:[#allocation7 + $0x4c] ss:$12 sps:$4 sm:$0xff]  }
  0x40   :  { %2500 = vmatmul.mubr.msk.bf16.gmra.mrb[4].mxu1 %vm171_vm0, %v2817_v15  ;;  %2522 = vmatpush3.bf16.msra.mxu0 %v2845_v24  ;;  %v3359_v15 = vld [vmem:[#allocation7 + $0x38] ss:$12 sps:$4 sm:$0xff]  }
  0x41   :  { %2503 = vmatprep.mubr.msk.bf16.mxu1 %vm171_vm0, %v2818_v16  ;;  %499 = vmatpush1.bf16.msra.mxu1 %v2830_v18 }
  0x42   :  { %500 = vmatprep.subr.bf16.mxu1 %v2836_v19  ;;  %2523 = vmatprep.subr.bf16.mxu0 %v2849_v32 }
  0x44   :  { %2524 = vmatpush3.bf16.msra.mxu0 %v2849_v32 }
  0x45   :  { %501 = vmatpush1.bf16.msra.mxu1 %v2834_v20  ;;  %2525 = vmatprep.subr.bf16.mxu0 %v2853_v35 }
  0x46   :  { %502 = vmatprep.subr.bf16.mxu1 %v2840_v22 }
  0x48   :  { %2504 = vmatmul.mubr.msk.bf16.gmra.mrb[8].mxu1 %vm171_vm0, %v2819_v23  ;;  %2526 = vmatpush3.bf16.msra.mxu0 %v2853_v35  ;;  %v3367_v23 = vld [vmem:[#allocation7 + $0x48] ss:$12 sps:$4 sm:$0xff]  }
  0x49   :  { %2507 = vmatprep.mubr.msk.bf16.mxu1 %vm171_vm0, %v2820_v25  ;;  %503 = vmatpush1.bf16.msra.mxu1 %v2838_v26  ;;  %v3371_v25 = vld [vmem:[#allocation7 + $0x64] ss:$12 sps:$4 sm:$0xff]   ;;  %v3387_v35 = vld [vmem:[#allocation7 + $0x68] ss:$12 sps:$4 sm:$0xff]  }
  0x4a   :  { %504 = vmatprep.subr.bf16.mxu1 %v2844_v27  ;;  %2543 = vmatprep.subr.bf16.mxu0 %v4047_v38  ;;  %v3374_v26 = vld [vmem:[#allocation7 + $0x50] ss:$12 sps:$4 sm:$0xff]  }
  0x4d   :  { %505 = vmatpush1.bf16.msra.mxu1 %v2842_v28 }
  0x4e   :  { %506 = vmatprep.subr.bf16.mxu1 %v2848_v30 }
  0x50   :  { %2508 = vmatmul.mubr.msk.bf16.gmra.mrb[12].mxu1 %vm171_vm0, %v2821_v29 }
  0x51   :  { %507 = vmatpush1.bf16.msra.mxu1 %v2846_v31  ;;  %526 = vmatprep.mubr.bf16.mxu1 %v4045_v36  ;;  %v3380_v31 = vld [vmem:[#allocation7 + $0x60] ss:$12 sps:$4 sm:$0xff]  }
  0x52   :  { %508 = vmatprep.subr.bf16.mxu1 %v2852_v33 }
  0x55   :  { %509 = vmatpush1.bf16.msra.mxu1 %v2850_v34  ;;  %v3384_v34 = vld [vmem:[#allocation7 + $0x7c] ss:$12 sps:$4 sm:$0xff]  }
  0x56   :  { %931 = vmatprep.subr.bf16.mxu1 %v3315_v37 }
 0x10b   :  { %v2497_v40 = vpop.f32.mrb[0].mxu1 }
 0x10c   :  { %v239_v41 = vadd.f32 %v2497_v40, %v3322_v39  ;;  %v230_v42 = vpop.f32.mrb[1].mxu1 }
 0x10d   :  { %v231_v43 = vadd.f32 %v3322_v39, %v230_v42  ;;  %v2498_v44 = vpop.f32.mrb[2].mxu1 }
 0x10e   :  { %v242_v45 = vadd.f32 %v2498_v44, %v3322_v39  ;;  %v233_v46 = vpop.f32.mrb[3].mxu1  ;;  %v295_v48 = vmax.f32 %v239_v41, 0.0 }
 0x10f   :  { %v234_v47 = vadd.f32 %v3322_v39, %v233_v46  ;;  %v293_v50 = vmax.f32 %v231_v43, 0.0 }
 0x110   :  { %v296_v49 = vmax.f32 %v242_v45, 0.0 }
 0x111   :  { %v294_v51 = vmax.f32 %v234_v47, 0.0  ;;  %v3395_v47 = vld [vmem:[#allocation7 + $0x78] ss:$12 sps:$4 sm:$0xff]  }
 0x112   :  { %v310_v52 = vpack.c.bf16 %v296_v49, %v295_v48  ;;  %v3399_v49 = vld [vmem:[#allocation7 + $0x94] ss:$12 sps:$4 sm:$0xff]  }
 0x113   :  { %v309_v54 = vpack.c.bf16 %v294_v51, %v293_v50  ;;  %v2501_v55 = vpop.f32.mrb[4].mxu1  ;;  %v3402_v50 = vld [vmem:[#allocation7 + $0x80] ss:$12 sps:$4 sm:$0xff]  }
 0x114   :  { %v255_v57 = vadd.f32 %v2501_v55, %v3322_v39  ;;  %v246_v58 = vpop.f32.mrb[5].mxu1  ;;  %v3409_v55 = vld [vmem:[#allocation7 + $0xac] ss:$12 sps:$4 sm:$0xff]  }
 0x115   :  { %v247_v60 = vadd.f32 %v3322_v39, %v246_v58  ;;  %527 = vmatmul.mubr.bf16.vlgmr.msra.gmra.mrb[16].mxu1 %v309_v54  ;;  %2527 = vmatprep.mubr.bf16.mxu0 %v309_v54  ;;  %v2502_v61 = vpop.f32.mrb[6].mxu1  ;;  %v3417_v58 = vld [vmem:[#allocation7 + $0xa8] ss:$12 sps:$4 sm:$0xff]  }
 0x116   :  { %v299_v62 = vmax.f32 %v255_v57, 0.0  ;;  %932 = vmatpush1.bf16.msra.mxu1 %v3328_v53  ;;  %v258_v63 = vadd.f32 %v2502_v61, %v3322_v39  ;;  %2528 = vmatmul.mubr.bf16.vlgmr.msra.gmra.mrb[0].mxu0 %v310_v52  ;;  %v249_v0 = vpop.f32.mrb[7].mxu1  ;;  %v3412_v57 = vld [vmem:[#allocation7 + $0x98] ss:$12 sps:$4 sm:$0xff]  }
 0x117   :  { %v297_v2 = vmax.f32 %v247_v60, 0.0  ;;  %v250_v3 = vadd.f32 %v3322_v39, %v249_v0  ;;  %536 = vmatprep.mubr.bf16.mxu1 %v4045_v36  ;;  %933 = vmatprep.subr.bf16.mxu1 %v3330_v56  ;;  %v3422_v60 = vld [vmem:[#allocation7 + $0xb0] ss:$12 sps:$4 sm:$0xff]   ;;  %v3430_v61 = vld [vmem:[%s4034_s1] sm:$0xff]  ;;  %v351_v0 = vlaneseq }
 0x118   :  { %v300_v5 = vmax.f32 %v258_v63, 0.0  ;;  %2544 = vmatpush3.bf16.msra.mxu0 %v3333_v59 }
 0x119   :  { %v298_v7 = vmax.f32 %v250_v3, 0.0  ;;  %2545 = vmatprep.subr.bf16.mxu0 %v4047_v38 }
 0x11a   :  { %v3349_v8 = vpack.c.bf16 %v300_v5, %v299_v62  ;;  %934 = vmatpush1.bf16.msra.mxu1 %v3338_v1  ;;  %v3435_v62 = vld [vmem:[%s4034_s1 + $0x8] sm:$0xff]  ;;  %v349_v5 = vld [vmem:[%s4038_s5] sm:$0x7] }
 0x11b   :  { %v311_v9 = vpack.c.bf16 %v298_v7, %v297_v2  ;;  %v2505_v10 = vpop.f32.mrb[8].mxu1  ;;  %935 = vmatprep.subr.bf16.mxu1 %v3343_v4  ;;  %v802_v63 = vpack.c.bf16 %v3435_v62, %v3430_v61  ;;  %v352_v2 = vshrl.u32 %v351_v0, 7 }
 0x11c   :  { %v271_v12 = vadd.f32 %v2505_v10, %v3322_v39  ;;  %v262_v13 = vpop.f32.mrb[9].mxu1  ;;  %2546 = vmatpush3.bf16.msra.mxu0 %v3346_v6 }
 0x11d   :  { %537 = vmatmul.mubr.bf16.gmra.mrb[20].mxu1 %v310_v52  ;;  %2531 = vmatprep.mubr.bf16.mxu0 %v311_v9  ;;  %v263_v16 = vadd.f32 %v3322_v39, %v262_v13  ;;  %v2506_v17 = vpop.f32.mrb[10].mxu1  ;;  %v361_v3 = vsub.s32 2, %v352_v2 }
 0x11e   :  { %2532 = vmatmul.mubr.bf16.gmra.mrb[4].mxu0 %v3349_v8  ;;  %v303_v18 = vmax.f32 %v271_v12, 0.0  ;;  %546 = vmatprep.mubr.bf16.mxu1 %v4045_v36  ;;  %v274_v19 = vadd.f32 %v2506_v17, %v3322_v39  ;;  %v265_v20 = vpop.f32.mrb[11].mxu1 }
 0x11f   :  { %v301_v21 = vmax.f32 %v263_v16, 0.0  ;;  %936 = vmatpush1.bf16.msra.mxu1 %v3353_v11  ;;  %v266_v22 = vadd.f32 %v3322_v39, %v265_v20  ;;  %2547 = vmatprep.subr.bf16.mxu0 %v4047_v38  ;;  %v3486_v7 = vrot.slane %v349_v5, %v361_v3 }
 0x120   :  { %v304_v24 = vmax.f32 %v274_v19, 0.0  ;;  %937 = vmatprep.subr.bf16.mxu1 %v3356_v14  ;;  %2548 = vmatpush3.bf16.msra.mxu0 %v3359_v15 }
 0x121   :  { %v302_v27 = vmax.f32 %v266_v22, 0.0  ;;  %2549 = vmatprep.subr.bf16.mxu0 %v4047_v38 }
 0x122   :  { %v3377_v28 = vpack.c.bf16 %v304_v24, %v303_v18 }
 0x123   :  { %v313_v29 = vpack.c.bf16 %v302_v27, %v301_v21  ;;  %938 = vmatpush1.bf16.msra.mxu1 %v3367_v23  ;;  %v2509_v30 = vpop.f32.mrb[12].mxu1 }
 0x124   :  { %v287_v32 = vadd.f32 %v2509_v30, %v3322_v39  ;;  %939 = vmatprep.subr.bf16.mxu1 %v3371_v25  ;;  %v278_v33 = vpop.f32.mrb[13].mxu1  ;;  %2550 = vmatpush3.bf16.msra.mxu0 %v3374_v26 }
 0x125   :  { %547 = vmatmul.mubr.bf16.gmra.mrb[24].mxu1 %v311_v9  ;;  %2535 = vmatprep.mubr.bf16.mxu0 %v313_v29  ;;  %v279_v40 = vadd.f32 %v3322_v39, %v278_v33  ;;  %v2510_v41 = vpop.f32.mrb[14].mxu1 }
 0x126   :  { %556 = vmatprep.mubr.bf16.mxu1 %v4045_v36  ;;  %2536 = vmatmul.mubr.bf16.gmra.mrb[8].mxu0 %v3377_v28  ;;  %v307_v42 = vmax.f32 %v287_v32, 0.0  ;;  %v290_v43 = vadd.f32 %v2510_v41, %v3322_v39  ;;  %v281_v44 = vpop.f32.mrb[15].mxu1 }
 0x127   :  { %v305_v45 = vmax.f32 %v279_v40, 0.0  ;;  %940 = vmatpush1.bf16.msra.mxu1 %v3380_v31  ;;  %v282_v46 = vadd.f32 %v3322_v39, %v281_v44  ;;  %2551 = vmatprep.subr.bf16.mxu0 %v4047_v38  ;;  %v3406_v39 = vld [vmem:[#allocation7 + $0x90] ss:$12 sps:$4 sm:$0xff]  }
 0x128   :  { %v308_v48 = vmax.f32 %v290_v43, 0.0  ;;  %941 = vmatprep.subr.bf16.mxu1 %v3384_v34  ;;  %2552 = vmatpush3.bf16.msra.mxu0 %v3387_v35 }
 0x129   :  { %v306_v51 = vmax.f32 %v282_v46, 0.0  ;;  %2553 = vmatprep.subr.bf16.mxu0 %v4047_v38 }
 0x12a   :  { %v316_v52 = vpack.c.bf16 %v308_v48, %v307_v42 }
 0x12b   :  { %v315_v54 = vpack.c.bf16 %v306_v51, %v305_v45  ;;  %942 = vmatpush1.bf16.msra.mxu1 %v3395_v47 }
 0x12c   :  { %943 = vmatprep.subr.bf16.mxu1 %v3399_v49  ;;  %2554 = vmatpush3.bf16.msra.mxu0 %v3402_v50 }
 0x12d   :  { %557 = vmatmul.mubr.bf16.gmra.mrb[28].mxu1 %v3349_v8  ;;  %2539 = vmatprep.mubr.bf16.mxu0 %v315_v54 }
 0x12e   :  { %566 = vmatprep.mubr.bf16.mxu1 %v4045_v36  ;;  %2540 = vmatmul.mubr.bf16.gmra.mrb[12].mxu0 %v316_v52 }
 0x12f   :  { %944 = vmatpush1.bf16.msra.mxu1 %v3406_v39  ;;  %2555 = vmatprep.subr.bf16.mxu0 %v4047_v38 }
 0x130   :  { %945 = vmatprep.subr.bf16.mxu1 %v3409_v55  ;;  %2556 = vmatpush3.bf16.msra.mxu0 %v3412_v57 }
 0x131   :  { %2557 = vmatprep.subr.bf16.mxu0 %v4047_v38  ;;  %2559 = vmatprep.mubr.msk.bf16.mxu0 %vm3181_vm1, %v4047_v38 }
 0x133   :  { %946 = vmatpush1.bf16.msra.mxu1 %v3417_v58 }
 0x134   :  { %2558 = vmatpush3.bf16.msra.mxu0 %v3422_v60  ;;  %1068 = vmatprep.subr.bf16.mxu1 %v3315_v37 }
 0x135   :  { %567 = vmatmul.mubr.bf16.gmra.mrb[32].mxu1 %v313_v29  ;;  %2563 = vmatprep.subr.bf16.mxu0 %v4047_v38 }
 0x136   :  { %576 = vmatprep.mubr.bf16.mxu1 %v4045_v36 }
 0x137   :  { %2560 = vmatmul.mubr.bf16.vlgmr.msra.gmra.mrb[16].mxu0 %v802_v63 }
 0x138   :  { %2564 = vmatpush3.bf16.msra.mxu0 %v3333_v59  ;;  %2579 = vmatprep.mubr.msk.bf16.mxu0 %vm3181_vm1, %v4047_v38 }
 0x139   :  { %2565 = vmatprep.subr.bf16.mxu0 %v4047_v38 }
 0x13c   :  { %2566 = vmatpush3.bf16.msra.mxu0 %v3346_v6 }
 0x13d   :  { %577 = vmatmul.mubr.bf16.gmra.mrb[36].mxu1 %v3377_v28  ;;  %2567 = vmatprep.subr.bf16.mxu0 %v4047_v38 }
 0x13e   :  { %586 = vmatprep.mubr.bf16.mxu1 %v4045_v36 }
 0x140   :  { %2568 = vmatpush3.bf16.msra.mxu0 %v3359_v15 }
 0x141   :  { %2569 = vmatprep.subr.bf16.mxu0 %v4047_v38 }
 0x144   :  { %2570 = vmatpush3.bf16.msra.mxu0 %v3374_v26 }
 0x145   :  { %587 = vmatmul.mubr.bf16.gmra.mrb[40].mxu1 %v315_v54  ;;  %2571 = vmatprep.subr.bf16.mxu0 %v4047_v38 }
 0x146   :  { %596 = vmatprep.mubr.bf16.mxu1 %v4045_v36 }
 0x148   :  { %2572 = vmatpush3.bf16.msra.mxu0 %v3387_v35 }
 0x149   :  { %2573 = vmatprep.subr.bf16.mxu0 %v4047_v38 }
 0x14c   :  { %2574 = vmatpush3.bf16.msra.mxu0 %v3402_v50 }
 0x14d   :  { %597 = vmatmul.mubr.bf16.gmra.mrb[44].mxu1 %v316_v52  ;;  %2575 = vmatprep.subr.bf16.mxu0 %v4047_v38 }
 0x14e   :  { %963 = vmatprep.mubr.bf16.mxu1 %v4045_v36 }
 0x150   :  { %2576 = vmatpush3.bf16.msra.mxu0 %v3412_v57 }
 0x151   :  { %2577 = vmatprep.subr.bf16.mxu0 %v4047_v38 }
 0x154   :  { %2578 = vmatpush3.bf16.msra.mxu0 %v3422_v60 }
 0x155   :  { %964 = vmatmul.mubr.bf16.vlgmr.msra.gmra.mrb[16].mxu1 %v802_v63  ;;  %2583 = vmatprep.subr.bf16.mxu0 %v4047_v38 }
 0x156   :  { %1069 = vmatpush1.bf16.msra.mxu1 %v3328_v53  ;;  %1100 = vmatprep.mubr.bf16.mxu1 %v4045_v36 }
 0x157   :  { %1070 = vmatprep.subr.bf16.mxu1 %v3330_v56 }
 0x15a   :  { %1071 = vmatpush1.bf16.msra.mxu1 %v3338_v1 }
 0x15b   :  { %1072 = vmatprep.subr.bf16.mxu1 %v3343_v4 }
 0x15e   :  { %1073 = vmatpush1.bf16.msra.mxu1 %v3353_v11 }
 0x15f   :  { %1074 = vmatprep.subr.bf16.mxu1 %v3356_v14 }
 0x162   :  { %1075 = vmatpush1.bf16.msra.mxu1 %v3367_v23 }
 0x163   :  { %1076 = vmatprep.subr.bf16.mxu1 %v3371_v25 }
 0x166   :  { %1077 = vmatpush1.bf16.msra.mxu1 %v3380_v31 }
 0x167   :  { %1078 = vmatprep.subr.bf16.mxu1 %v3384_v34 }
 0x16a   :  { %1079 = vmatpush1.bf16.msra.mxu1 %v3395_v47 }
 0x16b   :  { %1080 = vmatprep.subr.bf16.mxu1 %v3399_v49 }
 0x16e   :  { %1081 = vmatpush1.bf16.msra.mxu1 %v3406_v39 }
 0x16f   :  { %1082 = vmatprep.subr.bf16.mxu1 %v3409_v55 }
 0x172   :  { %1083 = vmatpush1.bf16.msra.mxu1 %v3417_v58 }
 0x173   :  { %1206 = vmatprep.subr.bf16.mxu1 %v3315_v37 }
 0x1e9   :  { %v2529_v8 = vpop.f32.mrb[0].mxu0 }
 0x1ea   :  { %v3489_v9 = vadd.f32 %v2529_v8, %v3486_v7  ;;  %v3491_v10 = vpop.f32.mrb[1].mxu0 }
 0x1eb   :  { %v2530_v12 = vpop.f32.mrb[2].mxu0 }
 0x1ec   :  { %v3494_v13 = vadd.f32 %v2530_v12, %v3486_v7  ;;  %v3496_v16 = vpop.f32.mrb[3].mxu0  ;;  %v353_v12 = vsub.s32 0, %v352_v2 }
 0x1f1   :  { %v2533_v17 = vpop.f32.mrb[4].mxu0 }
 0x1f2   :  { %v3499_v18 = vadd.f32 %v2533_v17, %v3486_v7  ;;  %v657_v19 = vpop.f32.mrb[5].mxu0  ;;  %v3534_v17 = vrot.slane %v349_v5, %v353_v12 }
 0x1f3   :  { %v3502_v20 = vadd.f32 %v657_v19, %v3486_v7  ;;  %v2534_v21 = vpop.f32.mrb[6].mxu0 }
 0x1f4   :  { %v3505_v22 = vadd.f32 %v2534_v21, %v3486_v7  ;;  %v660_v24 = vpop.f32.mrb[7].mxu0 }
 0x1f5   :  { %v3508_v27 = vadd.f32 %v660_v24, %v3486_v7  ;;  %v357_v24 = vsub.s32 1, %v352_v2 }
 0x1f9   :  { %v2537_v28 = vpop.f32.mrb[8].mxu0 }
 0x1fa   :  { %v3511_v29 = vadd.f32 %v2537_v28, %v3486_v7  ;;  %v673_v30 = vpop.f32.mrb[9].mxu0 }
 0x1fb   :  { %v3514_v32 = vadd.f32 %v673_v30, %v3486_v7  ;;  %v2538_v33 = vpop.f32.mrb[10].mxu0 }
 0x1fc   :  { %v3517_v40 = vadd.f32 %v2538_v33, %v3486_v7  ;;  %v676_v41 = vpop.f32.mrb[11].mxu0 }
 0x1fd   :  { %v3520_v42 = vadd.f32 %v676_v41, %v3486_v7 }
 0x201   :  { %v2541_v43 = vpop.f32.mrb[12].mxu0 }
 0x202   :  { %v3523_v44 = vadd.f32 %v2541_v43, %v3486_v7  ;;  %v689_v45 = vpop.f32.mrb[13].mxu0 }
 0x203   :  { %v3526_v46 = vadd.f32 %v689_v45, %v3486_v7  ;;  %v2542_v48 = vpop.f32.mrb[14].mxu0  ;;  %v3538_v45 = vrot.slane %v349_v5, %v357_v24  ;;  %v3545_v5 = vld [vmem:[%s4040_s7] ss:$0 sm:$0xff] }
 0x204   :  { %v3529_v51 = vadd.f32 %v2542_v48, %v3486_v7  ;;  %v692_v52 = vpop.f32.mrb[15].mxu0 }
 0x205   :  { %v3532_v54 = vadd.f32 %v692_v52, %v3486_v7 }
 0x206   :  { %4049 = vst [vmem:[#allocation16_spill] sm:$0xff] %v3529_v51 }
 0x20a   :  { %v1008_v63 = vpop.f32.mrb[16].mxu0 }
 0x20b   :  { %v2561_v0 = vpop.f32.mrb[17].mxu0  ;;  %v1043_v24 = vadd.f32 %v3545_v5, %v1008_v63 }
 0x20c   :  { %v1011_v3 = vpop.f32.mrb[18].mxu0 }
 0x20d   :  { %v2562_v8 = vpop.f32.mrb[19].mxu0 }
 0x228   :  { %v965_v19 = vpop.f32.mrb[16].mxu1 }
 0x229   :  { %v2735_v21 = vadd.f32 %v965_v19, %v3534_v17  ;;  %v967_v28 = vpop.f32.mrb[17].mxu1 }
 0x22a   :  { %v969_v30 = vpop.f32.mrb[18].mxu1  ;;  %v2736_v52 = vadd.f32 %v967_v28, %v3538_v45 }
 0x22b   :  { %v2330_v33 = vmul.f32 -1.442695, %v2735_v21  ;;  %v2737_v41 = vadd.f32 %v969_v30, %v3534_v17  ;;  %v971_v43 = vpop.f32.mrb[19].mxu1 }
 0x22c   :  { %v2738_v0 = vadd.f32 %v971_v43, %v3538_v45  ;;  %v2332_v8 = vmul.f32 -1.442695, %v2736_v52 }
 0x22d   :  { %2894 = vpow2.f32 %v2330_v33  ;;  %v2331_v48 = vmul.f32 -1.442695, %v2737_v41  ;;  %v642_v41 = vadd.f32 %v3491_v10, %v3486_v7 }
 0x22e   :  { %v2333_v36 = vmul.f32 -1.442695, %v2738_v0 }
 0x22f   :  { %2896 = vpow2.f32 %v2331_v48  ;;  %v1044_v48 = vadd.f32 %v3545_v5, %v1011_v3 }
 0x230   :  { %2898 = vpow2.f32 %v2332_v8 }
 0x237   :  { %v2895_v12 = vpop.eup %2894 }
 0x238   :  { %v1023_v19 = vadd.f32 1.0, %v2895_v12 }
 0x239   :  { %v2897_v2 = vpop.eup %2896 }
 0x23a   :  { %2900 = vrcp.f32 %v1023_v19  ;;  %v1024_v21 = vadd.f32 1.0, %v2897_v2  ;;  %v2899_v28 = vpop.eup %2898 }
 0x23b   :  { %2902 = vpow2.f32 %v2333_v36  ;;  %v1037_v0 = vadd.f32 1.0, %v2899_v28  ;;  %v645_v36 = vadd.f32 %v3496_v16, %v3486_v7 }
 0x23c   :  { %2904 = vrcp.f32 %v1024_v21 }
 0x244   :  { %v2901_v30 = vpop.eup %2900 }
 0x245   :  { %v2903_v33 = vpop.eup %2902  ;;  %v1045_v43 = vmul.f32 %v2901_v30, %v1043_v24 }
 0x246   :  { %v2905_v52 = vpop.eup %2904  ;;  %v1038_v19 = vadd.f32 1.0, %v2903_v33 }
 0x247   :  { %v1047_v8 = vadd.f32 %v1045_v43, %v642_v41  ;;  %v1046_v12 = vmul.f32 %v2905_v52, %v1044_v48 }
 0x249   :  { %2906 = vtanh.f32 %v1047_v8  ;;  %v1048_v2 = vadd.f32 %v1046_v12, %v645_v36 }
 0x24a   :  { %2908 = vrcp.f32 %v1037_v0 }
 0x24b   :  { %2910 = vtanh.f32 %v1048_v2 }
 0x24c   :  { %2912 = vrcp.f32 %v1038_v19 }
 0x253   :  { %v2907_v63 = vpop.eup %2906 }
 0x254   :  { %v2909_v21 = vpop.eup %2908  ;;  %v1051_v10 = vsub.f32 %v3430_v61, %v2907_v63  ;;  %v4050_v61 = vmov 0.0  }
 0x255   :  { %v2911_v24 = vpop.eup %2910 }
 0x256   :  { %v1052_v3 = vsub.f32 %v3435_v62, %v2911_v24  ;;  %v1053_v30 = vmul.f32 %v2909_v21, %v1051_v10  ;;  %v2913_v28 = vpop.eup %2912  ;;  %v4051_v62 = vmov 0  }
 0x258   :  { %v1054_v38 = vmul.f32 %v2913_v28, %v1052_v3  ;;  %v3555_v51 = vadd.f32 %v2907_v63, %v1053_v30 }
 0x25a   :  { %v3557_v7 = vadd.f32 %v2911_v24, %v1054_v38 }
 0x25c   :  { %v3561_v16 = vpack.c.bf16 %v3557_v7, %v3555_v51 }
 0x25e   :  { %1101 = vmatmul.mubr.bf16.vlgmr.msra.gmra.mrb[20].mxu1 %v3561_v16  ;;  %2580 = vmatmul.mubr.bf16.vlgmr.msra.gmra.mrb[20].mxu0 %v3561_v16 }
 0x25f   :  { %1207 = vmatpush1.bf16.msra.mxu1 %v3328_v53  ;;  %2584 = vmatpush3.bf16.msra.mxu0 %v3333_v59 }
 0x260   :  { %1208 = vmatprep.subr.bf16.mxu1 %v3330_v56  ;;  %2585 = vmatprep.subr.bf16.mxu0 %v4050_v61 }
 0x261   :  { %1238 = vmatprep.mubr.bf16.mxu1 %v4051_v62  ;;  %2599 = vmatprep.mubr.msk.bf16.mxu0 %vm3181_vm1, %v4050_v61 }
 0x263   :  { %1209 = vmatpush1.bf16.msra.mxu1 %v3338_v1  ;;  %2586 = vmatpush3.bf16.msra.mxu0 %v3346_v6 }
 0x264   :  { %1210 = vmatprep.subr.bf16.mxu1 %v3343_v4  ;;  %2587 = vmatprep.subr.bf16.mxu0 %v4050_v61 }
 0x267   :  { %1211 = vmatpush1.bf16.msra.mxu1 %v3353_v11  ;;  %2588 = vmatpush3.bf16.msra.mxu0 %v3359_v15 }
 0x268   :  { %1212 = vmatprep.subr.bf16.mxu1 %v3356_v14  ;;  %2589 = vmatprep.subr.bf16.mxu0 %v4050_v61 }
 0x26b   :  { %1213 = vmatpush1.bf16.msra.mxu1 %v3367_v23  ;;  %2590 = vmatpush3.bf16.msra.mxu0 %v3374_v26 }
 0x26c   :  { %1214 = vmatprep.subr.bf16.mxu1 %v3371_v25  ;;  %2591 = vmatprep.subr.bf16.mxu0 %v4050_v61 }
 0x26f   :  { %1215 = vmatpush1.bf16.msra.mxu1 %v3380_v31  ;;  %2592 = vmatpush3.bf16.msra.mxu0 %v3387_v35 }
 0x270   :  { %1216 = vmatprep.subr.bf16.mxu1 %v3384_v34  ;;  %2593 = vmatprep.subr.bf16.mxu0 %v4050_v61 }
 0x273   :  { %1217 = vmatpush1.bf16.msra.mxu1 %v3395_v47  ;;  %2594 = vmatpush3.bf16.msra.mxu0 %v3402_v50 }
 0x274   :  { %1218 = vmatprep.subr.bf16.mxu1 %v3399_v49  ;;  %2595 = vmatprep.subr.bf16.mxu0 %v4050_v61 }
 0x277   :  { %1219 = vmatpush1.bf16.msra.mxu1 %v3406_v39  ;;  %2596 = vmatpush3.bf16.msra.mxu0 %v3412_v57 }
 0x278   :  { %1220 = vmatprep.subr.bf16.mxu1 %v3409_v55  ;;  %2597 = vmatprep.subr.bf16.mxu0 %v4050_v61 }
 0x27b   :  { %1221 = vmatpush1.bf16.msra.mxu1 %v3417_v58  ;;  %2598 = vmatpush3.bf16.msra.mxu0 %v3422_v60 }
 0x27c   :  { %1344 = vmatprep.subr.bf16.mxu1 %v3315_v37  ;;  %2603 = vmatprep.subr.bf16.mxu0 %v4050_v61 }
 0x331   :  { %v1102_v38 = vpop.f32.mrb[20].mxu1  ;;  %v1145_v33 = vpop.f32.mrb[20].mxu0 }
 0x332   :  { %v2739_v41 = vadd.f32 %v1102_v38, %v3534_v17  ;;  %v1104_v43 = vpop.f32.mrb[21].mxu1  ;;  %v2581_v48 = vpop.f32.mrb[21].mxu0 }
 0x333   :  { %v1106_v52 = vpop.f32.mrb[22].mxu1  ;;  %v1148_v0 = vpop.f32.mrb[22].mxu0  ;;  %v2740_v63 = vadd.f32 %v1104_v43, %v3538_v45  ;;  %v1180_v48 = vadd.f32 %v3545_v5, %v1145_v33 }
 0x334   :  { %v2334_v36 = vmul.f32 -1.442695, %v2739_v41  ;;  %v2741_v8 = vadd.f32 %v1106_v52, %v3534_v17  ;;  %v1108_v12 = vpop.f32.mrb[23].mxu1  ;;  %v2582_v19 = vpop.f32.mrb[23].mxu0  ;;  %v1181_v43 = vadd.f32 %v3545_v5, %v1148_v0 }
 0x335   :  { %v2742_v21 = vadd.f32 %v1108_v12, %v3538_v45  ;;  %v2336_v10 = vmul.f32 -1.442695, %v2740_v63 }
 0x336   :  { %2914 = vpow2.f32 %v2334_v36  ;;  %v2335_v2 = vmul.f32 -1.442695, %v2741_v8 }
 0x337   :  { %v2337_v3 = vmul.f32 -1.442695, %v2742_v21 }
 0x338   :  { %2916 = vpow2.f32 %v2335_v2 }
 0x339   :  { %2918 = vpow2.f32 %v2336_v10 }
 0x340   :  { %v2915_v24 = vpop.eup %2914 }
 0x341   :  { %v1160_v30 = vadd.f32 1.0, %v2915_v24 }
 0x342   :  { %v2917_v28 = vpop.eup %2916 }
 0x343   :  { %2920 = vrcp.f32 %v1160_v30  ;;  %v1161_v38 = vadd.f32 1.0, %v2917_v28  ;;  %v2919_v41 = vpop.eup %2918 }
 0x344   :  { %2922 = vpow2.f32 %v2337_v3  ;;  %v1174_v12 = vadd.f32 1.0, %v2919_v41 }
 0x345   :  { %2924 = vrcp.f32 %v1161_v38 }
 0x34d   :  { %v2921_v52 = vpop.eup %2920 }
 0x34e   :  { %v2923_v36 = vpop.eup %2922  ;;  %v1182_v8 = vmul.f32 %v2921_v52, %v1180_v48 }
 0x34f   :  { %v2925_v19 = vpop.eup %2924  ;;  %v1175_v10 = vadd.f32 1.0, %v2923_v36 }
 0x350   :  { %v1184_v2 = vadd.f32 %v1182_v8, %v3489_v9  ;;  %v1183_v63 = vmul.f32 %v2925_v19, %v1181_v43 }
 0x352   :  { %2926 = vtanh.f32 %v1184_v2  ;;  %v1185_v21 = vadd.f32 %v1183_v63, %v3494_v13 }
 0x353   :  { %2928 = vrcp.f32 %v1174_v12 }
 0x354   :  { %2930 = vtanh.f32 %v1185_v21 }
 0x355   :  { %2932 = vrcp.f32 %v1175_v10 }
 0x35c   :  { %v2927_v24 = vpop.eup %2926 }
 0x35d   :  { %v2929_v3 = vpop.eup %2928  ;;  %v1188_v33 = vsub.f32 %v3555_v51, %v2927_v24 }
 0x35e   :  { %v2931_v30 = vpop.eup %2930 }
 0x35f   :  { %v1189_v28 = vsub.f32 %v3557_v7, %v2931_v30  ;;  %v1190_v0 = vmul.f32 %v2929_v3, %v1188_v33  ;;  %v2933_v38 = vpop.eup %2932 }
 0x361   :  { %v1191_v41 = vmul.f32 %v2933_v38, %v1189_v28  ;;  %v3610_v48 = vadd.f32 %v2927_v24, %v1190_v0 }
 0x363   :  { %v3612_v9 = vadd.f32 %v2931_v30, %v1191_v41 }
 0x365   :  { %v3616_v13 = vpack.c.bf16 %v3612_v9, %v3610_v48 }
 0x367   :  { %1239 = vmatmul.mubr.bf16.vlgmr.msra.gmra.mrb[24].mxu1 %v3616_v13  ;;  %2600 = vmatmul.mubr.bf16.vlgmr.msra.gmra.mrb[24].mxu0 %v3616_v13 }
 0x368   :  { %1345 = vmatpush1.bf16.msra.mxu1 %v3328_v53  ;;  %2604 = vmatpush3.bf16.msra.mxu0 %v3333_v59 }
 0x369   :  { %1346 = vmatprep.subr.bf16.mxu1 %v3330_v56  ;;  %2605 = vmatprep.subr.bf16.mxu0 %v4050_v61 }
 0x36a   :  { %1376 = vmatprep.mubr.bf16.mxu1 %v4051_v62  ;;  %2619 = vmatprep.mubr.msk.bf16.mxu0 %vm3181_vm1, %v4050_v61 }
 0x36c   :  { %1347 = vmatpush1.bf16.msra.mxu1 %v3338_v1  ;;  %2606 = vmatpush3.bf16.msra.mxu0 %v3346_v6 }
 0x36d   :  { %1348 = vmatprep.subr.bf16.mxu1 %v3343_v4  ;;  %2607 = vmatprep.subr.bf16.mxu0 %v4050_v61 }
 0x370   :  { %1349 = vmatpush1.bf16.msra.mxu1 %v3353_v11  ;;  %2608 = vmatpush3.bf16.msra.mxu0 %v3359_v15 }
 0x371   :  { %1350 = vmatprep.subr.bf16.mxu1 %v3356_v14  ;;  %2609 = vmatprep.subr.bf16.mxu0 %v4050_v61 }
 0x374   :  { %1351 = vmatpush1.bf16.msra.mxu1 %v3367_v23  ;;  %2610 = vmatpush3.bf16.msra.mxu0 %v3374_v26 }
 0x375   :  { %1352 = vmatprep.subr.bf16.mxu1 %v3371_v25  ;;  %2611 = vmatprep.subr.bf16.mxu0 %v4050_v61 }
 0x378   :  { %1353 = vmatpush1.bf16.msra.mxu1 %v3380_v31  ;;  %2612 = vmatpush3.bf16.msra.mxu0 %v3387_v35 }
 0x379   :  { %1354 = vmatprep.subr.bf16.mxu1 %v3384_v34  ;;  %2613 = vmatprep.subr.bf16.mxu0 %v4050_v61 }
 0x37c   :  { %1355 = vmatpush1.bf16.msra.mxu1 %v3395_v47  ;;  %2614 = vmatpush3.bf16.msra.mxu0 %v3402_v50 }
 0x37d   :  { %1356 = vmatprep.subr.bf16.mxu1 %v3399_v49  ;;  %2615 = vmatprep.subr.bf16.mxu0 %v4050_v61 }
 0x380   :  { %1357 = vmatpush1.bf16.msra.mxu1 %v3406_v39  ;;  %2616 = vmatpush3.bf16.msra.mxu0 %v3412_v57 }
 0x381   :  { %1358 = vmatprep.subr.bf16.mxu1 %v3409_v55  ;;  %2617 = vmatprep.subr.bf16.mxu0 %v4050_v61 }
 0x384   :  { %1359 = vmatpush1.bf16.msra.mxu1 %v3417_v58  ;;  %2618 = vmatpush3.bf16.msra.mxu0 %v3422_v60 }
 0x385   :  { %1482 = vmatprep.subr.bf16.mxu1 %v3315_v37  ;;  %2623 = vmatprep.subr.bf16.mxu0 %v4050_v61 }
 0x43a   :  { %v1240_v51 = vpop.f32.mrb[24].mxu1  ;;  %v1283_v7 = vpop.f32.mrb[24].mxu0 }
 0x43b   :  { %v2743_v52 = vadd.f32 %v1240_v51, %v3534_v17  ;;  %v1242_v36 = vpop.f32.mrb[25].mxu1  ;;  %v2601_v8 = vpop.f32.mrb[25].mxu0 }
 0x43c   :  { %v1244_v43 = vpop.f32.mrb[26].mxu1  ;;  %v1286_v19 = vpop.f32.mrb[26].mxu0  ;;  %v2744_v24 = vadd.f32 %v1242_v36, %v3538_v45 }
 0x43d   :  { %v2338_v12 = vmul.f32 -1.442695, %v2743_v52  ;;  %v2745_v2 = vadd.f32 %v1244_v43, %v3534_v17  ;;  %v1246_v63 = vpop.f32.mrb[27].mxu1  ;;  %v2602_v21 = vpop.f32.mrb[27].mxu0  ;;  %v1318_v52 = vadd.f32 %v3545_v5, %v1283_v7  ;;  %v1319_v36 = vadd.f32 %v3545_v5, %v1286_v19 }
 0x43e   :  { %v2746_v3 = vadd.f32 %v1246_v63, %v3538_v45  ;;  %v2340_v33 = vmul.f32 -1.442695, %v2744_v24 }
 0x43f   :  { %2934 = vpow2.f32 %v2338_v12  ;;  %v2339_v10 = vmul.f32 -1.442695, %v2745_v2 }
 0x440   :  { %v2341_v28 = vmul.f32 -1.442695, %v2746_v3 }
 0x441   :  { %2936 = vpow2.f32 %v2339_v10 }
 0x442   :  { %2938 = vpow2.f32 %v2340_v33 }
 0x449   :  { %v2935_v30 = vpop.eup %2934 }
 0x44a   :  { %v1298_v0 = vadd.f32 1.0, %v2935_v30 }
 0x44b   :  { %v2937_v38 = vpop.eup %2936 }
 0x44c   :  { %2940 = vrcp.f32 %v1298_v0  ;;  %v1299_v41 = vadd.f32 1.0, %v2937_v38  ;;  %v2939_v51 = vpop.eup %2938 }
 0x44d   :  { %2942 = vpow2.f32 %v2341_v28  ;;  %v1312_v63 = vadd.f32 1.0, %v2939_v51 }
 0x44e   :  { %2944 = vrcp.f32 %v1299_v41 }
 0x456   :  { %v2941_v8 = vpop.eup %2940 }
 0x457   :  { %v2943_v43 = vpop.eup %2942  ;;  %v1320_v12 = vmul.f32 %v2941_v8, %v1318_v52 }
 0x458   :  { %v2945_v2 = vpop.eup %2944  ;;  %v1313_v3 = vadd.f32 1.0, %v2943_v43 }
 0x459   :  { %v1322_v21 = vadd.f32 %v1320_v12, %v3502_v20  ;;  %v1321_v10 = vmul.f32 %v2945_v2, %v1319_v36 }
 0x45b   :  { %2946 = vtanh.f32 %v1322_v21  ;;  %v1323_v24 = vadd.f32 %v1321_v10, %v3508_v27 }
 0x45c   :  { %2948 = vrcp.f32 %v1312_v63 }
 0x45d   :  { %2950 = vtanh.f32 %v1323_v24 }
 0x45e   :  { %2952 = vrcp.f32 %v1313_v3 }
 0x465   :  { %v2947_v33 = vpop.eup %2946 }
 0x466   :  { %v2949_v30 = vpop.eup %2948  ;;  %v1326_v7 = vsub.f32 %v3610_v48, %v2947_v33 }
 0x467   :  { %v2951_v28 = vpop.eup %2950 }
 0x468   :  { %v1327_v0 = vsub.f32 %v3612_v9, %v2951_v28  ;;  %v1328_v19 = vmul.f32 %v2949_v30, %v1326_v7  ;;  %v2953_v38 = vpop.eup %2952 }
 0x46a   :  { %v1329_v41 = vmul.f32 %v2953_v38, %v1327_v0  ;;  %v3665_v51 = vadd.f32 %v2947_v33, %v1328_v19 }
 0x46c   :  { %v3667_v20 = vadd.f32 %v2951_v28, %v1329_v41 }
 0x46e   :  { %v3671_v27 = vpack.c.bf16 %v3667_v20, %v3665_v51 }
 0x470   :  { %1377 = vmatmul.mubr.bf16.vlgmr.msra.gmra.mrb[28].mxu1 %v3671_v27  ;;  %2620 = vmatmul.mubr.bf16.vlgmr.msra.gmra.mrb[28].mxu0 %v3671_v27 }
 0x471   :  { %1483 = vmatpush1.bf16.msra.mxu1 %v3328_v53  ;;  %2624 = vmatpush3.bf16.msra.mxu0 %v3333_v59 }
 0x472   :  { %1484 = vmatprep.subr.bf16.mxu1 %v3330_v56  ;;  %2625 = vmatprep.subr.bf16.mxu0 %v4050_v61 }
 0x473   :  { %1514 = vmatprep.mubr.bf16.mxu1 %v4051_v62  ;;  %2639 = vmatprep.mubr.msk.bf16.mxu0 %vm3181_vm1, %v4050_v61 }
 0x475   :  { %1485 = vmatpush1.bf16.msra.mxu1 %v3338_v1  ;;  %2626 = vmatpush3.bf16.msra.mxu0 %v3346_v6 }
 0x476   :  { %1486 = vmatprep.subr.bf16.mxu1 %v3343_v4  ;;  %2627 = vmatprep.subr.bf16.mxu0 %v4050_v61 }
 0x479   :  { %1487 = vmatpush1.bf16.msra.mxu1 %v3353_v11  ;;  %2628 = vmatpush3.bf16.msra.mxu0 %v3359_v15 }
 0x47a   :  { %1488 = vmatprep.subr.bf16.mxu1 %v3356_v14  ;;  %2629 = vmatprep.subr.bf16.mxu0 %v4050_v61 }
 0x47d   :  { %1489 = vmatpush1.bf16.msra.mxu1 %v3367_v23  ;;  %2630 = vmatpush3.bf16.msra.mxu0 %v3374_v26 }
 0x47e   :  { %1490 = vmatprep.subr.bf16.mxu1 %v3371_v25  ;;  %2631 = vmatprep.subr.bf16.mxu0 %v4050_v61 }
 0x481   :  { %1491 = vmatpush1.bf16.msra.mxu1 %v3380_v31  ;;  %2632 = vmatpush3.bf16.msra.mxu0 %v3387_v35 }
 0x482   :  { %1492 = vmatprep.subr.bf16.mxu1 %v3384_v34  ;;  %2633 = vmatprep.subr.bf16.mxu0 %v4050_v61 }
 0x485   :  { %1493 = vmatpush1.bf16.msra.mxu1 %v3395_v47  ;;  %2634 = vmatpush3.bf16.msra.mxu0 %v3402_v50 }
 0x486   :  { %1494 = vmatprep.subr.bf16.mxu1 %v3399_v49  ;;  %2635 = vmatprep.subr.bf16.mxu0 %v4050_v61 }
 0x489   :  { %1495 = vmatpush1.bf16.msra.mxu1 %v3406_v39  ;;  %2636 = vmatpush3.bf16.msra.mxu0 %v3412_v57 }
 0x48a   :  { %1496 = vmatprep.subr.bf16.mxu1 %v3409_v55  ;;  %2637 = vmatprep.subr.bf16.mxu0 %v4050_v61 }
 0x48d   :  { %1497 = vmatpush1.bf16.msra.mxu1 %v3417_v58  ;;  %2638 = vmatpush3.bf16.msra.mxu0 %v3422_v60 }
 0x48e   :  { %1620 = vmatprep.subr.bf16.mxu1 %v3315_v37  ;;  %2643 = vmatprep.subr.bf16.mxu0 %v4050_v61 }
 0x543   :  { %v1378_v53 = vpop.f32.mrb[28].mxu1  ;;  %v1421_v56 = vpop.f32.mrb[28].mxu0 }
 0x544   :  { %v2747_v59 = vadd.f32 %v1378_v53, %v3534_v17  ;;  %v1380_v1 = vpop.f32.mrb[29].mxu1  ;;  %v2621_v4 = vpop.f32.mrb[29].mxu0  ;;  %v1456_v7 = vadd.f32 %v3545_v5, %v1421_v56 }
 0x545   :  { %v1382_v48 = vpop.f32.mrb[30].mxu1  ;;  %v1424_v9 = vpop.f32.mrb[30].mxu0  ;;  %v2748_v37 = vadd.f32 %v1380_v1, %v3538_v45 }
 0x546   :  { %v2342_v52 = vmul.f32 -1.442695, %v2747_v59  ;;  %v2749_v8 = vadd.f32 %v1382_v48, %v3534_v17  ;;  %v1384_v43 = vpop.f32.mrb[31].mxu1  ;;  %v2622_v12 = vpop.f32.mrb[31].mxu0  ;;  %v1457_v38 = vadd.f32 %v3545_v5, %v1424_v9 }
 0x547   :  { %v2750_v2 = vadd.f32 %v1384_v43, %v3538_v45  ;;  %v2344_v63 = vmul.f32 -1.442695, %v2748_v37 }
 0x548   :  { %2954 = vpow2.f32 %v2342_v52  ;;  %v2343_v36 = vmul.f32 -1.442695, %v2749_v8 }
 0x549   :  { %v2345_v10 = vmul.f32 -1.442695, %v2750_v2 }
 0x54a   :  { %2956 = vpow2.f32 %v2343_v36 }
 0x54b   :  { %2958 = vpow2.f32 %v2344_v63  ;;  %v3730_v63 = vld [vmem:[#allocation7] ss:$12 sps:$4 sm:$0xff]  }
 0x552   :  { %v2955_v21 = vpop.eup %2954 }
 0x553   :  { %v1436_v24 = vadd.f32 1.0, %v2955_v21  ;;  %v3743_v21 = vld [vmem:[#allocation7 + $0x18] ss:$12 sps:$4 sm:$0xff]  }
 0x554   :  { %v2957_v3 = vpop.eup %2956 }
 0x555   :  { %2960 = vrcp.f32 %v1436_v24  ;;  %v1437_v33 = vadd.f32 1.0, %v2957_v3  ;;  %v2959_v30 = vpop.eup %2958 }
 0x556   :  { %2962 = vpow2.f32 %v2345_v10  ;;  %v1450_v53 = vadd.f32 1.0, %v2959_v30  ;;  %v3747_v10 = vld [vmem:[#allocation7 + $0x34] ss:$12 sps:$4 sm:$0xff]  }
 0x557   :  { %2964 = vrcp.f32 %v1437_v33 }
 0x55f   :  { %v2961_v28 = vpop.eup %2960 }
 0x560   :  { %v2963_v0 = vpop.eup %2962  ;;  %v1458_v19 = vmul.f32 %v2961_v28, %v1456_v7 }
 0x561   :  { %v2965_v41 = vpop.eup %2964  ;;  %v1451_v48 = vadd.f32 1.0, %v2963_v0 }
 0x562   :  { %v1460_v59 = vadd.f32 %v1458_v19, %v3499_v18  ;;  %v1459_v1 = vmul.f32 %v2965_v41, %v1457_v38 }
 0x564   :  { %2966 = vtanh.f32 %v1460_v59  ;;  %v1461_v4 = vadd.f32 %v1459_v1, %v3505_v22 }
 0x565   :  { %2968 = vrcp.f32 %v1450_v53 }
 0x566   :  { %2970 = vtanh.f32 %v1461_v4 }
 0x567   :  { %2972 = vrcp.f32 %v1451_v48 }
 0x56e   :  { %v2967_v52 = vpop.eup %2966 }
 0x56f   :  { %v2969_v8 = vpop.eup %2968  ;;  %v1464_v56 = vsub.f32 %v3665_v51, %v2967_v52  ;;  %v3733_v51 = vld [vmem:[#allocation7 + $0x8] ss:$12 sps:$4 sm:$0xff]  }
 0x570   :  { %v2971_v43 = vpop.eup %2970 }
 0x571   :  { %v1465_v12 = vsub.f32 %v3667_v20, %v2971_v43  ;;  %v1466_v9 = vmul.f32 %v2969_v8, %v1464_v56  ;;  %v2973_v36 = vpop.eup %2972  ;;  %v3736_v20 = vld [vmem:[#allocation7 + $0x1c] ss:$12 sps:$4 sm:$0xff]  }
 0x573   :  { %v1467_v37 = vmul.f32 %v2973_v36, %v1465_v12  ;;  %v3720_v2 = vadd.f32 %v2967_v52, %v1466_v9 }
 0x575   :  { %v3722_v18 = vadd.f32 %v2971_v43, %v1467_v37 }
 0x577   :  { %v3726_v22 = vpack.c.bf16 %v3722_v18, %v3720_v2 }
 0x579   :  { %1515 = vmatmul.mubr.bf16.vlgmr.msra.gmra.mrb[32].mxu1 %v3726_v22  ;;  %2640 = vmatmul.mubr.bf16.vlgmr.msra.gmra.mrb[32].mxu0 %v3726_v22 }
 0x57a   :  { %1621 = vmatpush1.bf16.msra.mxu1 %v3730_v63  ;;  %2644 = vmatpush3.bf16.msra.mxu0 %v3733_v51 }
 0x57b   :  { %1622 = vmatprep.subr.bf16.mxu1 %v3736_v20  ;;  %2645 = vmatprep.subr.bf16.mxu0 %v4050_v61 }
 0x57c   :  { %1652 = vmatprep.mubr.bf16.mxu1 %v4051_v62  ;;  %2659 = vmatprep.mubr.msk.bf16.mxu0 %vm3181_vm1, %v4050_v61 }
 0x57e   :  { %1623 = vmatpush1.bf16.msra.mxu1 %v3743_v21  ;;  %2646 = vmatpush3.bf16.msra.mxu0 %v3346_v6  ;;  %v3773_v6 = vld [vmem:[#allocation7 + $0x4] ss:$12 sps:$4 sm:$0xff]  }
 0x57f   :  { %1624 = vmatprep.subr.bf16.mxu1 %v3747_v10  ;;  %2647 = vmatprep.subr.bf16.mxu0 %v4050_v61 }
 0x582   :  { %1625 = vmatpush1.bf16.msra.mxu1 %v3353_v11  ;;  %2648 = vmatpush3.bf16.msra.mxu0 %v3359_v15 }
 0x583   :  { %1626 = vmatprep.subr.bf16.mxu1 %v3356_v14  ;;  %2649 = vmatprep.subr.bf16.mxu0 %v4050_v61 }
 0x586   :  { %1627 = vmatpush1.bf16.msra.mxu1 %v3367_v23  ;;  %2650 = vmatpush3.bf16.msra.mxu0 %v3374_v26 }
 0x587   :  { %1628 = vmatprep.subr.bf16.mxu1 %v3371_v25  ;;  %2651 = vmatprep.subr.bf16.mxu0 %v4050_v61 }
 0x58a   :  { %1629 = vmatpush1.bf16.msra.mxu1 %v3380_v31  ;;  %2652 = vmatpush3.bf16.msra.mxu0 %v3387_v35 }
 0x58b   :  { %1630 = vmatprep.subr.bf16.mxu1 %v3384_v34  ;;  %2653 = vmatprep.subr.bf16.mxu0 %v4050_v61 }
 0x58e   :  { %1631 = vmatpush1.bf16.msra.mxu1 %v3395_v47  ;;  %2654 = vmatpush3.bf16.msra.mxu0 %v3402_v50 }
 0x58f   :  { %1632 = vmatprep.subr.bf16.mxu1 %v3399_v49  ;;  %2655 = vmatprep.subr.bf16.mxu0 %v4050_v61 }
 0x592   :  { %1633 = vmatpush1.bf16.msra.mxu1 %v3406_v39  ;;  %2656 = vmatpush3.bf16.msra.mxu0 %v3412_v57 }
 0x593   :  { %1634 = vmatprep.subr.bf16.mxu1 %v3409_v55  ;;  %2657 = vmatprep.subr.bf16.mxu0 %v4050_v61 }
 0x596   :  { %1635 = vmatpush1.bf16.msra.mxu1 %v3417_v58  ;;  %2658 = vmatpush3.bf16.msra.mxu0 %v3422_v60 }
 0x597   :  { %1758 = vmatprep.subr.bf16.mxu1 %v3773_v6  ;;  %2663 = vmatprep.subr.bf16.mxu0 %v4050_v61 }
 0x64c   :  { %v1516_v11 = vpop.f32.mrb[32].mxu1  ;;  %v1559_v14 = vpop.f32.mrb[32].mxu0 }
 0x64d   :  { %v2751_v15 = vadd.f32 %v1516_v11, %v3534_v17  ;;  %v1518_v23 = vpop.f32.mrb[33].mxu1  ;;  %v2641_v25 = vpop.f32.mrb[33].mxu0  ;;  %v1594_v7 = vadd.f32 %v3545_v5, %v1559_v14  ;;  %v3813_v14 = vld [vmem:[#allocation7 + $0x38] ss:$12 sps:$4 sm:$0xff]  }
 0x64e   :  { %v1520_v26 = vpop.f32.mrb[34].mxu1  ;;  %v1562_v31 = vpop.f32.mrb[34].mxu0  ;;  %v2752_v39 = vadd.f32 %v1518_v23, %v3538_v45  ;;  %v3820_v23 = vld [vmem:[#allocation7 + $0x48] ss:$12 sps:$4 sm:$0xff]   ;;  %v3823_v25 = vld [vmem:[#allocation7 + $0x50] ss:$12 sps:$4 sm:$0xff]  }
 0x64f   :  { %v2346_v34 = vmul.f32 -1.442695, %v2751_v15  ;;  %v2753_v35 = vadd.f32 %v1520_v26, %v3534_v17  ;;  %v1522_v47 = vpop.f32.mrb[35].mxu1  ;;  %v2642_v49 = vpop.f32.mrb[35].mxu0  ;;  %v1595_v38 = vadd.f32 %v3545_v5, %v1562_v31  ;;  %v3816_v15 = vld [vmem:[#allocation7 + $0x4c] ss:$12 sps:$4 sm:$0xff]  }
 0x650   :  { %v2754_v55 = vadd.f32 %v1522_v47, %v3538_v45  ;;  %v2348_v57 = vmul.f32 -1.442695, %v2752_v39  ;;  %v3826_v26 = vld [vmem:[#allocation7 + $0x64] ss:$12 sps:$4 sm:$0xff]   ;;  %v3830_v31 = vld [vmem:[#allocation7 + $0x60] ss:$12 sps:$4 sm:$0xff]  }
 0x651   :  { %2974 = vpow2.f32 %v2346_v34  ;;  %v2347_v50 = vmul.f32 -1.442695, %v2753_v35  ;;  %v3833_v34 = vld [vmem:[#allocation7 + $0x68] ss:$12 sps:$4 sm:$0xff]   ;;  %v3840_v47 = vld [vmem:[#allocation7 + $0x78] ss:$12 sps:$4 sm:$0xff]  }
 0x652   :  { %v2349_v60 = vmul.f32 -1.442695, %v2754_v55  ;;  %v3836_v35 = vld [vmem:[#allocation7 + $0x7c] ss:$12 sps:$4 sm:$0xff]   ;;  %v3843_v49 = vld [vmem:[#allocation7 + $0x80] ss:$12 sps:$4 sm:$0xff]  }
 0x653   :  { %2976 = vpow2.f32 %v2347_v50  ;;  %v3846_v50 = vld [vmem:[#allocation7 + $0x94] ss:$12 sps:$4 sm:$0xff]   ;;  %v3850_v39 = vld [vmem:[#allocation7 + $0x90] ss:$12 sps:$4 sm:$0xff]   ;;  %v3853_v55 = vld [vmem:[#allocation7 + $0x98] ss:$12 sps:$4 sm:$0xff]  }
 0x654   :  { %2978 = vpow2.f32 %v2348_v57  ;;  %v3856_v57 = vld [vmem:[#allocation7 + $0xac] ss:$12 sps:$4 sm:$0xff]  }
 0x65b   :  { %v2975_v58 = vpop.eup %2974 }
 0x65c   :  { %v1574_v24 = vadd.f32 1.0, %v2975_v58  ;;  %v3860_v58 = vld [vmem:[#allocation7 + $0xa8] ss:$12 sps:$4 sm:$0xff]  }
 0x65d   :  { %v2977_v3 = vpop.eup %2976 }
 0x65e   :  { %2980 = vrcp.f32 %v1574_v24  ;;  %v1575_v33 = vadd.f32 1.0, %v2977_v3  ;;  %v2979_v30 = vpop.eup %2978 }
 0x65f   :  { %2982 = vpow2.f32 %v2349_v60  ;;  %v1588_v53 = vadd.f32 1.0, %v2979_v30  ;;  %v3863_v60 = vld [vmem:[#allocation7 + $0xb0] ss:$12 sps:$4 sm:$0xff]  }
 0x660   :  { %2984 = vrcp.f32 %v1575_v33 }
 0x668   :  { %v2981_v28 = vpop.eup %2980 }
 0x669   :  { %v2983_v0 = vpop.eup %2982  ;;  %v1596_v19 = vmul.f32 %v2981_v28, %v1594_v7 }
 0x66a   :  { %v2985_v41 = vpop.eup %2984  ;;  %v1589_v48 = vadd.f32 1.0, %v2983_v0 }
 0x66b   :  { %v1598_v59 = vadd.f32 %v1596_v19, %v3514_v32  ;;  %v1597_v1 = vmul.f32 %v2985_v41, %v1595_v38 }
 0x66d   :  { %2986 = vtanh.f32 %v1598_v59  ;;  %v1599_v4 = vadd.f32 %v1597_v1, %v3520_v42 }
 0x66e   :  { %2988 = vrcp.f32 %v1588_v53 }
 0x66f   :  { %2990 = vtanh.f32 %v1599_v4 }
 0x670   :  { %2992 = vrcp.f32 %v1589_v48 }
 0x677   :  { %v2987_v52 = vpop.eup %2986 }
 0x678   :  { %v2989_v8 = vpop.eup %2988  ;;  %v1602_v56 = vsub.f32 %v3720_v2, %v2987_v52  ;;  %v3805_v2 = vld [vmem:[#allocation7 + $0x20] ss:$12 sps:$4 sm:$0xff]  }
 0x679   :  { %v2991_v43 = vpop.eup %2990 }
 0x67a   :  { %v1603_v12 = vsub.f32 %v3722_v18, %v2991_v43  ;;  %v1604_v9 = vmul.f32 %v2989_v8, %v1602_v56  ;;  %v2993_v36 = vpop.eup %2992  ;;  %v3810_v18 = vld [vmem:[#allocation7 + $0x30] ss:$12 sps:$4 sm:$0xff]  }
 0x67c   :  { %v1605_v37 = vmul.f32 %v2993_v36, %v1603_v12  ;;  %v3787_v11 = vadd.f32 %v2987_v52, %v1604_v9 }
 0x67e   :  { %v3789_v32 = vadd.f32 %v2991_v43, %v1605_v37 }
 0x680   :  { %v3793_v42 = vpack.c.bf16 %v3789_v32, %v3787_v11 }
 0x682   :  { %1653 = vmatmul.mubr.bf16.vlgmr.msra.gmra.mrb[36].mxu1 %v3793_v42  ;;  %2660 = vmatmul.mubr.bf16.vlgmr.msra.gmra.mrb[36].mxu0 %v3793_v42 }
 0x683   :  { %1759 = vmatpush1.bf16.msra.mxu1 %v3730_v63  ;;  %2664 = vmatpush3.bf16.msra.mxu0 %v3733_v51 }
 0x684   :  { %1760 = vmatprep.subr.bf16.mxu1 %v3736_v20  ;;  %2665 = vmatprep.subr.bf16.mxu0 %v4050_v61 }
 0x685   :  { %1790 = vmatprep.mubr.bf16.mxu1 %v4051_v62  ;;  %2679 = vmatprep.mubr.msk.bf16.mxu0 %vm3181_vm1, %v4050_v61 }
 0x687   :  { %1761 = vmatpush1.bf16.msra.mxu1 %v3743_v21  ;;  %2666 = vmatpush3.bf16.msra.mxu0 %v3805_v2 }
 0x688   :  { %1762 = vmatprep.subr.bf16.mxu1 %v3747_v10  ;;  %2667 = vmatprep.subr.bf16.mxu0 %v4050_v61 }
 0x68b   :  { %1763 = vmatpush1.bf16.msra.mxu1 %v3810_v18  ;;  %2668 = vmatpush3.bf16.msra.mxu0 %v3813_v14 }
 0x68c   :  { %1764 = vmatprep.subr.bf16.mxu1 %v3816_v15  ;;  %2669 = vmatprep.subr.bf16.mxu0 %v4050_v61 }
 0x68f   :  { %1765 = vmatpush1.bf16.msra.mxu1 %v3820_v23  ;;  %2670 = vmatpush3.bf16.msra.mxu0 %v3823_v25 }
 0x690   :  { %1766 = vmatprep.subr.bf16.mxu1 %v3826_v26  ;;  %2671 = vmatprep.subr.bf16.mxu0 %v4050_v61 }
 0x693   :  { %1767 = vmatpush1.bf16.msra.mxu1 %v3830_v31  ;;  %2672 = vmatpush3.bf16.msra.mxu0 %v3833_v34 }
 0x694   :  { %1768 = vmatprep.subr.bf16.mxu1 %v3836_v35  ;;  %2673 = vmatprep.subr.bf16.mxu0 %v4050_v61 }
 0x697   :  { %1769 = vmatpush1.bf16.msra.mxu1 %v3840_v47  ;;  %2674 = vmatpush3.bf16.msra.mxu0 %v3843_v49 }
 0x698   :  { %1770 = vmatprep.subr.bf16.mxu1 %v3846_v50  ;;  %2675 = vmatprep.subr.bf16.mxu0 %v4050_v61 }
 0x69b   :  { %1771 = vmatpush1.bf16.msra.mxu1 %v3850_v39  ;;  %2676 = vmatpush3.bf16.msra.mxu0 %v3853_v55 }
 0x69c   :  { %1772 = vmatprep.subr.bf16.mxu1 %v3856_v57  ;;  %2677 = vmatprep.subr.bf16.mxu0 %v4050_v61 }
 0x69f   :  { %1773 = vmatpush1.bf16.msra.mxu1 %v3860_v58  ;;  %2678 = vmatpush3.bf16.msra.mxu0 %v3863_v60 }
 0x6a0   :  { %2683 = vmatprep.subr.bf16.mxu0 %v4050_v61  ;;  %1896 = vmatprep.subr.bf16.mxu1 %v3773_v6 }
 0x755   :  { %v1654_v24 = vpop.f32.mrb[36].mxu1  ;;  %v1697_v3 = vpop.f32.mrb[36].mxu0 }
 0x756   :  { %v2755_v33 = vadd.f32 %v1654_v24, %v3534_v17  ;;  %v1656_v30 = vpop.f32.mrb[37].mxu1  ;;  %v2661_v7 = vpop.f32.mrb[37].mxu0  ;;  %v1732_v9 = vadd.f32 %v3545_v5, %v1697_v3 }
 0x757   :  { %v1658_v28 = vpop.f32.mrb[38].mxu1  ;;  %v1700_v0 = vpop.f32.mrb[38].mxu0  ;;  %v2756_v1 = vadd.f32 %v1656_v30, %v3538_v45 }
 0x758   :  { %v2350_v19 = vmul.f32 -1.442695, %v2755_v33  ;;  %v2757_v38 = vadd.f32 %v1658_v28, %v3534_v17  ;;  %v1660_v41 = vpop.f32.mrb[39].mxu1  ;;  %v2662_v53 = vpop.f32.mrb[39].mxu0  ;;  %v1733_v33 = vadd.f32 %v3545_v5, %v1700_v0 }
 0x759   :  { %v2758_v6 = vadd.f32 %v1660_v41, %v3538_v45  ;;  %v2352_v4 = vmul.f32 -1.442695, %v2756_v1 }
 0x75a   :  { %2994 = vpow2.f32 %v2350_v19  ;;  %v2351_v59 = vmul.f32 -1.442695, %v2757_v38 }
 0x75b   :  { %v2353_v52 = vmul.f32 -1.442695, %v2758_v6 }
 0x75c   :  { %2996 = vpow2.f32 %v2351_v59 }
 0x75d   :  { %2998 = vpow2.f32 %v2352_v4 }
 0x764   :  { %v2995_v48 = vpop.eup %2994 }
 0x765   :  { %v1712_v8 = vadd.f32 1.0, %v2995_v48 }
 0x766   :  { %v2997_v56 = vpop.eup %2996 }
 0x767   :  { %3000 = vrcp.f32 %v1712_v8  ;;  %v1713_v43 = vadd.f32 1.0, %v2997_v56  ;;  %v2999_v12 = vpop.eup %2998 }
 0x768   :  { %3002 = vpow2.f32 %v2353_v52  ;;  %v1726_v7 = vadd.f32 1.0, %v2999_v12 }
 0x769   :  { %3004 = vrcp.f32 %v1713_v43 }
 0x771   :  { %v3001_v36 = vpop.eup %3000 }
 0x772   :  { %v3003_v37 = vpop.eup %3002  ;;  %v1734_v24 = vmul.f32 %v3001_v36, %v1732_v9 }
 0x773   :  { %v3005_v30 = vpop.eup %3004  ;;  %v1727_v41 = vadd.f32 1.0, %v3003_v37 }
 0x774   :  { %v1736_v28 = vadd.f32 %v1734_v24, %v3511_v29  ;;  %v1735_v19 = vmul.f32 %v3005_v30, %v1733_v33 }
 0x776   :  { %3006 = vtanh.f32 %v1736_v28  ;;  %v1737_v38 = vadd.f32 %v1735_v19, %v3517_v40 }
 0x777   :  { %3008 = vrcp.f32 %v1726_v7 }
 0x778   :  { %3010 = vtanh.f32 %v1737_v38 }
 0x779   :  { %3012 = vrcp.f32 %v1727_v41 }
 0x780   :  { %v3007_v53 = vpop.eup %3006 }
 0x781   :  { %v3009_v59 = vpop.eup %3008  ;;  %v1740_v3 = vsub.f32 %v3787_v11, %v3007_v53 }
 0x782   :  { %v3011_v1 = vpop.eup %3010 }
 0x783   :  { %v1741_v6 = vsub.f32 %v3789_v32, %v3011_v1  ;;  %v1742_v5 = vmul.f32 %v3009_v59, %v1740_v3  ;;  %v3013_v0 = vpop.eup %3012  ;;  %v2888_v59 = vld [vmem:[%s4041_s8 + $0x10] sm:$0xff]   ;;  %v2889_v3 = vld [vmem:[%s4041_s8 + $0x18] sm:$0xff]  }
 0x785   :  { %v1743_v4 = vmul.f32 %v3013_v0, %v1741_v6  ;;  %v3878_v48 = vadd.f32 %v3007_v53, %v1742_v5  ;;  %v2887_v53 = vld [vmem:[%s4041_s8 + $0x8] sm:$0xff]   ;;  %v2892_v6 = vld [vmem:[%s4041_s8 + $0x30] sm:$0xff]   ;;  %v2893_v5 = vld [vmem:[%s4041_s8 + $0x38] sm:$0xff]  }
 0x787   :  { %v3880_v29 = vadd.f32 %v3011_v1, %v1743_v4  ;;  %v2890_v1 = vld [vmem:[%s4041_s8 + $0x20] sm:$0xff]  }
 0x789   :  { %v3884_v40 = vpack.c.bf16 %v3880_v29, %v3878_v48 }
 0x78b   :  { %1791 = vmatmul.mubr.bf16.vlgmr.msra.gmra.mrb[40].mxu1 %v3884_v40  ;;  %2680 = vmatmul.mubr.bf16.vlgmr.msra.gmra.mrb[40].mxu0 %v3884_v40 }
 0x78c   :  { %2684 = vmatpush3.bf16.msra.mxu0 %v3733_v51  ;;  %1897 = vmatpush1.bf16.msra.mxu1 %v3730_v63 }
 0x78d   :  { %2685 = vmatprep.subr.bf16.mxu0 %v4050_v61  ;;  %1898 = vmatprep.subr.bf16.mxu1 %v3736_v20 }
 0x78e   :  { %1928 = vmatprep.mubr.bf16.mxu1 %v4051_v62  ;;  %2699 = vmatprep.mubr.msk.bf16.mxu0 %vm3181_vm1, %v4050_v61  ;;  %v2886_v62 = vld [vmem:[%s4041_s8] sm:$0xff]  }
 0x790   :  { %2686 = vmatpush3.bf16.msra.mxu0 %v3805_v2  ;;  %1899 = vmatpush1.bf16.msra.mxu1 %v3743_v21 }
 0x791   :  { %2687 = vmatprep.subr.bf16.mxu0 %v4050_v61  ;;  %1900 = vmatprep.subr.bf16.mxu1 %v3747_v10 }
 0x794   :  { %2688 = vmatpush3.bf16.msra.mxu0 %v3813_v14  ;;  %1901 = vmatpush1.bf16.msra.mxu1 %v3810_v18 }
 0x795   :  { %2689 = vmatprep.subr.bf16.mxu0 %v4050_v61  ;;  %1902 = vmatprep.subr.bf16.mxu1 %v3816_v15 }
 0x798   :  { %2690 = vmatpush3.bf16.msra.mxu0 %v3823_v25  ;;  %1903 = vmatpush1.bf16.msra.mxu1 %v3820_v23 }
 0x799   :  { %2691 = vmatprep.subr.bf16.mxu0 %v4050_v61  ;;  %1904 = vmatprep.subr.bf16.mxu1 %v3826_v26 }
 0x79c   :  { %2692 = vmatpush3.bf16.msra.mxu0 %v3833_v34  ;;  %1905 = vmatpush1.bf16.msra.mxu1 %v3830_v31 }
 0x79d   :  { %2693 = vmatprep.subr.bf16.mxu0 %v4050_v61  ;;  %1906 = vmatprep.subr.bf16.mxu1 %v3836_v35 }
 0x7a0   :  { %2694 = vmatpush3.bf16.msra.mxu0 %v3843_v49  ;;  %1907 = vmatpush1.bf16.msra.mxu1 %v3840_v47 }
 0x7a1   :  { %2695 = vmatprep.subr.bf16.mxu0 %v4050_v61  ;;  %1908 = vmatprep.subr.bf16.mxu1 %v3846_v50 }
 0x7a4   :  { %2696 = vmatpush3.bf16.msra.mxu0 %v3853_v55  ;;  %1909 = vmatpush1.bf16.msra.mxu1 %v3850_v39  ;;  %v3931_v39 = vld [vmem:[%s4040_s7] ss:$0 sm:$0xff] }
 0x7a5   :  { %2697 = vmatprep.subr.bf16.mxu0 %v4050_v61  ;;  %1910 = vmatprep.subr.bf16.mxu1 %v3856_v57 }
 0x7a8   :  { %2698 = vmatpush3.bf16.msra.mxu0 %v3863_v60  ;;  %1911 = vmatpush1.bf16.msra.mxu1 %v3860_v58 }
 0x7a9   :  { %2703 = vmatprep.subr.bf16.mxu0 %v2886_v62 }
 0x85e   :  { %v1792_v63 = vpop.f32.mrb[40].mxu1  ;;  %v1835_v51 = vpop.f32.mrb[40].mxu0 }
 0x85f   :  { %v2759_v20 = vadd.f32 %v1792_v63, %v3534_v17  ;;  %v1794_v21 = vpop.f32.mrb[41].mxu1  ;;  %v2681_v10 = vpop.f32.mrb[41].mxu0  ;;  %v1870_v55 = vadd.f32 %v3931_v39, %v1835_v51 }
 0x860   :  { %v1796_v11 = vpop.f32.mrb[42].mxu1  ;;  %v1838_v32 = vpop.f32.mrb[42].mxu0  ;;  %v2760_v23 = vadd.f32 %v1794_v21, %v3538_v45 }
 0x861   :  { %v2354_v61 = vmul.f32 -1.442695, %v2759_v20  ;;  %v2761_v2 = vadd.f32 %v1796_v11, %v3534_v17  ;;  %v1798_v18 = vpop.f32.mrb[43].mxu1  ;;  %v2682_v14 = vpop.f32.mrb[43].mxu0  ;;  %v1871_v52 = vadd.f32 %v3931_v39, %v1838_v32 }
 0x862   :  { %v2762_v25 = vadd.f32 %v1798_v18, %v3538_v45  ;;  %v2356_v26 = vmul.f32 -1.442695, %v2760_v23 }
 0x863   :  { %3014 = vpow2.f32 %v2354_v61  ;;  %v2355_v15 = vmul.f32 -1.442695, %v2761_v2 }
 0x864   :  { %v2357_v34 = vmul.f32 -1.442695, %v2762_v25 }
 0x865   :  { %3016 = vpow2.f32 %v2355_v15 }
 0x866   :  { %3018 = vpow2.f32 %v2356_v26 }
 0x86d   :  { %v3015_v31 = vpop.eup %3014 }
 0x86e   :  { %v1850_v35 = vadd.f32 1.0, %v3015_v31 }
 0x86f   :  { %v3017_v47 = vpop.eup %3016 }
 0x870   :  { %3020 = vrcp.f32 %v1850_v35  ;;  %v1851_v49 = vadd.f32 1.0, %v3017_v47  ;;  %v3019_v50 = vpop.eup %3018 }
 0x871   :  { %3022 = vpow2.f32 %v2357_v34  ;;  %v1864_v56 = vadd.f32 1.0, %v3019_v50  ;;  %v3981_v34 = vld [vmem:[%s4042_s9] ss:$0 sm:$0xff]  ;;  %v4052_v50 = vld [vmem:[#allocation16_spill] sm:$0xff]  ;;  %s3182_s9 = smov [#allocation10]  }
 0x872   :  { %3024 = vrcp.f32 %v1851_v49  ;;  %s2236_s3 = sshll.u32 %s3182_s9, 4  ;;  %s2237_s3 = int_to_ptr.vmem [resolvable:$true] %s2236_s3 }
 0x873   :  { %s3123_s26 = scalar_lea.vmem %s2237_s3, 256  ;;  %p3128_p3 = scmp.lt.s32.totalorder %s2237_s3, %s2237_s3 }
 0x874   :  { %p3124_p2 = scmp.ne.s32.totalorder %s2237_s3, %s3123_s26  ;;  %p3129_p4 = scmp.lt.s32.totalorder %s3123_s26, %s3123_s26 }
 0x876   :  { %p3130_p5 = por %p3129_p4, %p3128_p3 }
 0x878   :  { %p3131_p6 = pnand %p3130_p5, %p3124_p2 }
 0x87a   :  { %v3021_v57 = vpop.eup %3020 }
 0x87b   :  { %v3023_v58 = vpop.eup %3022  ;;  %v1872_v60 = vmul.f32 %v3021_v57, %v1870_v55 }
 0x87c   :  { %v3025_v8 = vpop.eup %3024  ;;  %v1865_v36 = vadd.f32 1.0, %v3023_v58 }
 0x87d   :  { %v1874_v43 = vadd.f32 %v1872_v60, %v3526_v46  ;;  %v1873_v12 = vmul.f32 %v3025_v8, %v1871_v52 }
 0x87f   :  { %3026 = vtanh.f32 %v1874_v43  ;;  %v1875_v9 = vadd.f32 %v1873_v12, %v3532_v54 }
 0x880   :  { %3028 = vrcp.f32 %v1864_v56 }
 0x881   :  { %3030 = vtanh.f32 %v1875_v9 }
 0x882   :  { %3032 = vrcp.f32 %v1865_v36 }
 0x889   :  { %v3027_v37 = vpop.eup %3026 }
 0x88a   :  { %v3029_v24 = vpop.eup %3028  ;;  %v1878_v33 = vsub.f32 %v3878_v48, %v3027_v37 }
 0x88b   :  { %v3031_v30 = vpop.eup %3030 }
 0x88c   :  { %v1879_v7 = vsub.f32 %v3880_v29, %v3031_v30  ;;  %v1880_v28 = vmul.f32 %v3029_v24, %v1878_v33  ;;  %v3033_v19 = vpop.eup %3032 }
 0x88e   :  { %v1881_v38 = vmul.f32 %v3033_v19, %v1879_v7  ;;  %v3939_v41 = vadd.f32 %v3027_v37, %v1880_v28 }
 0x890   :  { %v3941_v46 = vadd.f32 %v3031_v30, %v1881_v38 }
 0x892   :  { %v1884_v54 = vpack.c.bf16 %v3941_v46, %v3939_v41 }
 0x894   :  { %1929 = vmatmul.mubr.bf16.vlgmr.msra.gmra.mrb[44].mxu1 %v1884_v54  ;;  %2700 = vmatmul.mubr.bf16.vlgmr.msra.gmra.mrb[44].mxu0 %v1884_v54 }
 0x895   :  { %2704 = vmatpush3.bf16.msra.mxu0 %v2886_v62  ;;  %2719 = vmatprep.mubr.bf16.mxu0 %v3561_v16  ;;  %v2891_v16 = vld [vmem:[%s4041_s8 + $0x28] sm:$0xff]  }
 0x896   :  { %2705 = vmatprep.subr.bf16.mxu0 %v2887_v53 }
 0x899   :  { %2706 = vmatpush3.bf16.msra.mxu0 %v2887_v53 }
 0x89a   :  { %2707 = vmatprep.subr.bf16.mxu0 %v2888_v59 }
 0x89d   :  { %2708 = vmatpush3.bf16.msra.mxu0 %v2888_v59 }
 0x89e   :  { %2709 = vmatprep.subr.bf16.mxu0 %v2889_v3 }
 0x8a1   :  { %2710 = vmatpush3.bf16.msra.mxu0 %v2889_v3 }
 0x8a2   :  { %2711 = vmatprep.subr.bf16.mxu0 %v2890_v1 }
 0x8a5   :  { %2712 = vmatpush3.bf16.msra.mxu0 %v2890_v1 }
 0x8a6   :  { %2713 = vmatprep.subr.bf16.mxu0 %v2891_v16 }
 0x8a9   :  { %2714 = vmatpush3.bf16.msra.mxu0 %v2891_v16 }
 0x8aa   :  { %2715 = vmatprep.subr.bf16.mxu0 %v2892_v6 }
 0x8ad   :  { %2716 = vmatpush3.bf16.msra.mxu0 %v2892_v6 }
 0x8ae   :  { %2717 = vmatprep.subr.bf16.mxu0 %v2893_v5 }
 0x8b1   :  { %2718 = vmatpush3.bf16.msra.mxu0 %v2893_v5 }
 0x8b4   :  { %2720 = vmatmul.mubr.bf16.vlgmr.msra.gmra.mrb[48].mxu0 %v3616_v13 }
 0x8b5   :  { %2723 = vmatprep.mubr.bf16.mxu0 %v3671_v27 }
 0x8bc   :  { %2724 = vmatmul.mubr.bf16.gmra.mrb[52].mxu0 %v3726_v22 }
 0x8bd   :  { %2727 = vmatprep.mubr.bf16.mxu0 %v3793_v42 }
 0x8c4   :  { %2728 = vmatmul.mubr.bf16.gmra.mrb[56].mxu0 %v3884_v40 }
 0x8c5   :  { %2731 = vmatprep.mubr.bf16.mxu0 %v1884_v54 }
 0x967   :  { %v1930_v0 = vpop.f32.mrb[44].mxu1  ;;  %v1973_v4 = vpop.f32.mrb[44].mxu0 }
 0x968   :  { %v2763_v48 = vadd.f32 %v1930_v0, %v3534_v17  ;;  %v1932_v29 = vpop.f32.mrb[45].mxu1  ;;  %v2701_v62 = vpop.f32.mrb[45].mxu0  ;;  %v2008_v14 = vadd.f32 %v3931_v39, %v1973_v4 }
 0x969   :  { %v1934_v63 = vpop.f32.mrb[46].mxu1  ;;  %v1976_v51 = vpop.f32.mrb[46].mxu0  ;;  %v2764_v42 = vadd.f32 %v1932_v29, %v3538_v45 }
 0x96a   :  { %v2358_v20 = vmul.f32 -1.442695, %v2763_v48  ;;  %v2765_v13 = vadd.f32 %v1934_v63, %v3534_v17  ;;  %v1936_v21 = vpop.f32.mrb[47].mxu1  ;;  %v2702_v27 = vpop.f32.mrb[47].mxu0  ;;  %v2009_v26 = vadd.f32 %v3931_v39, %v1976_v51 }
 0x96b   :  { %v2766_v40 = vadd.f32 %v1936_v21, %v3538_v45  ;;  %v2360_v10 = vmul.f32 -1.442695, %v2764_v42 }
 0x96c   :  { %3034 = vpow2.f32 %v2358_v20  ;;  %v2359_v22 = vmul.f32 -1.442695, %v2765_v13 }
 0x96d   :  { %v2361_v32 = vmul.f32 -1.442695, %v2766_v40 }
 0x96e   :  { %3036 = vpow2.f32 %v2359_v22 }
 0x96f   :  { %3038 = vpow2.f32 %v2360_v10 }
 0x976   :  { %v3035_v11 = vpop.eup %3034 }
 0x977   :  { %v1988_v61 = vadd.f32 1.0, %v3035_v11 }
 0x978   :  { %v3037_v2 = vpop.eup %3036 }
 0x979   :  { %3040 = vrcp.f32 %v1988_v61  ;;  %v1989_v18 = vadd.f32 1.0, %v3037_v2  ;;  %v3039_v17 = vpop.eup %3038 }
 0x97a   :  { %3042 = vpow2.f32 %v2361_v32  ;;  %v2002_v45 = vadd.f32 1.0, %v3039_v17 }
 0x97b   :  { %3044 = vrcp.f32 %v1989_v18 }
 0x983   :  { %v3041_v15 = vpop.eup %3040 }
 0x984   :  { %v3043_v23 = vpop.eup %3042  ;;  %v2010_v25 = vmul.f32 %v3041_v15, %v2008_v14 }
 0x985   :  { %v3045_v31 = vpop.eup %3044  ;;  %v2003_v57 = vadd.f32 1.0, %v3043_v23 }
 0x986   :  { %v2012_v35 = vadd.f32 %v2010_v25, %v3523_v44  ;;  %v2011_v47 = vmul.f32 %v3045_v31, %v2009_v26 }
 0x987   :  { %v2721_v49 = vpop.f32.mrb[48].mxu0 }
 0x988   :  { %3046 = vtanh.f32 %v2012_v35  ;;  %v2013_v55 = vadd.f32 %v2011_v47, %v4052_v50  ;;  %v2149_v58 = vadd.f32 %v2721_v49, %v3981_v34  ;;  %v2140_v60 = vpop.f32.mrb[49].mxu0 }
 0x989   :  { %3048 = vrcp.f32 %v2002_v45  ;;  %v2141_v39 = vadd.f32 %v3981_v34, %v2140_v60  ;;  %v2722_v52 = vpop.f32.mrb[50].mxu0 }
 0x98a   :  { %3050 = vtanh.f32 %v2013_v55  ;;  %2205 = vst [vmem:[#allocation9 + $0x10] sm:$0xff] %v2149_v58  ;;  %v2152_v8 = vadd.f32 %v2722_v52, %v3981_v34  ;;  %v2143_v56 = vpop.f32.mrb[51].mxu0 }
 0x98b   :  { %2203 = vst [vmem:[#allocation9] sm:$0xff] %v2141_v39  ;;  %v2144_v44 = vadd.f32 %v3981_v34, %v2143_v56  ;;  %3052 = vrcp.f32 %v2003_v57 }
 0x98c   :  { %2206 = vst [vmem:[#allocation9 + $0x18] sm:$0xff] %v2152_v8 }
 0x98d   :  { %2204 = vst [vmem:[#allocation9 + $0x8] sm:$0xff] %v2144_v44 }
 0x98f   :  { %v2725_v43 = vpop.f32.mrb[52].mxu0 }
 0x990   :  { %v2165_v12 = vadd.f32 %v2725_v43, %v3981_v34  ;;  %v2156_v9 = vpop.f32.mrb[53].mxu0 }
 0x991   :  { %v2157_v36 = vadd.f32 %v3981_v34, %v2156_v9  ;;  %v2726_v37 = vpop.f32.mrb[54].mxu0 }
 0x992   :  { %v3047_v24 = vpop.eup %3046  ;;  %2209 = vst [vmem:[#allocation9 + $0x30] sm:$0xff] %v2165_v12  ;;  %v2168_v33 = vadd.f32 %v2726_v37, %v3981_v34  ;;  %v2159_v30 = vpop.f32.mrb[55].mxu0 }
 0x993   :  { %v3049_v7 = vpop.eup %3048  ;;  %2207 = vst [vmem:[#allocation9 + $0x20] sm:$0xff] %v2157_v36  ;;  %v2160_v28 = vadd.f32 %v3981_v34, %v2159_v30  ;;  %v2016_v19 = vsub.f32 %v3939_v41, %v3047_v24 }
 0x994   :  { %v3051_v38 = vpop.eup %3050  ;;  %2210 = vst [vmem:[#allocation9 + $0x38] sm:$0xff] %v2168_v33 }
 0x995   :  { %2208 = vst [vmem:[#allocation9 + $0x28] sm:$0xff] %v2160_v28  ;;  %v2017_v54 = vsub.f32 %v3941_v46, %v3051_v38  ;;  %v2018_v53 = vmul.f32 %v3049_v7, %v2016_v19  ;;  %v3053_v59 = vpop.eup %3052 }
 0x997   :  { %v2729_v3 = vpop.f32.mrb[56].mxu0  ;;  %v2019_v1 = vmul.f32 %v3053_v59, %v2017_v54  ;;  %v2020_v16 = vadd.f32 %v3047_v24, %v2018_v53 }
 0x998   :  { %v2181_v6 = vadd.f32 %v2729_v3, %v3981_v34  ;;  %v2172_v5 = vpop.f32.mrb[57].mxu0 }
 0x999   :  { %v2173_v0 = vadd.f32 %v3981_v34, %v2172_v5  ;;  %v2730_v4 = vpop.f32.mrb[58].mxu0  ;;  %v2021_v48 = vadd.f32 %v3051_v38, %v2019_v1  ;;  %2025 = vst [vmem:[#allocation10] sm:$0xff] %v2020_v16 }
 0x99a   :  { %2213 = vst [vmem:[#allocation9 + $0x50] sm:$0xff] %v2181_v6  ;;  %v2184_v41 = vadd.f32 %v2730_v4, %v3981_v34  ;;  %v2175_v29 = vpop.f32.mrb[59].mxu0 }
 0x99b   :  { %2211 = vst [vmem:[#allocation9 + $0x40] sm:$0xff] %v2173_v0  ;;  %v2176_v46 = vadd.f32 %v3981_v34, %v2175_v29  ;;  %v2022_v62 = vpack.c.bf16 %v2021_v48, %v2020_v16  ;;  %2026 = vst [vmem:[#allocation10 + $0x8] sm:$0xff] %v2021_v48 }
 0x99c   :  { %2214 = vst [vmem:[#allocation9 + $0x58] sm:$0xff] %v2184_v41 }
 0x99d   :  { %2212 = vst [vmem:[#allocation9 + $0x48] sm:$0xff] %v2176_v46  ;;  %2732 = vmatmul.mubr.bf16.gmra.mrb[60].mxu0 %v2022_v62 }
 0x99e   :  { %3134 = shalt.err (!%p3131_p6)
}
 0x99f   :  { %s3135_s1 = scalar_lea.hbm %s4044_s11, 256 }
 0x9a0   :  { %p3136_p7 = scmp.ne.s32.totalorder %s4044_s11, %s3135_s1  ;;  %p3139_p8 = scmp.lt.u32.totalorder %s3135_s1, %s4044_s11 }
 0x9a2   :  { %p3141_p9 = pnand %p3139_p8, %p3136_p7 }
 0x9a4   :  { %3144 = shalt.err (!%p3141_p9)
}
 0x9a5   :  { %s3183_s12 = smov 128   ;;  %s3184_s13 = smov 8  }
 0x9a6   :  { %2242 = dma.vmem_to_hbm [thread:$0]  %s2237_s3, 256, %s4044_s11, [#allocation11], %s3183_s12, %s3183_s12, %s3184_s13  }
 0x9a7   :  { %s3185_s15 = smov [#allocation9]  }
 0x9a8   :  { %s2224_s16 = sshll.u32 %s3185_s15, 4  ;;  %s2225_s16 = int_to_ptr.vmem [resolvable:$true] %s2224_s16 }
 0x9a9   :  { %s3145_s11 = scalar_lea.vmem %s2225_s16, 2048  ;;  %p3150_p11 = scmp.lt.s32.totalorder %s2225_s16, %s2225_s16 }
 0x9aa   :  { %p3146_p10 = scmp.ne.s32.totalorder %s2225_s16, %s3145_s11  ;;  %p3151_p12 = scmp.lt.s32.totalorder %s3145_s11, %s3145_s11 }
 0x9ac   :  { %p3152_p13 = por %p3151_p12, %p3150_p11 }
 0x9ae   :  { %p3153_p0 = pnand %p3152_p13, %p3146_p10 }
 0xa70   :  { %v2733_v63 = vpop.f32.mrb[60].mxu0 }
 0xa71   :  { %v2197_v51 = vadd.f32 %v2733_v63, %v3981_v34  ;;  %v2188_v20 = vpop.f32.mrb[61].mxu0 }
 0xa72   :  { %v2189_v13 = vadd.f32 %v3981_v34, %v2188_v20  ;;  %v2734_v21 = vpop.f32.mrb[62].mxu0 }
 0xa73   :  { %2217 = vst [vmem:[#allocation9 + $0x70] sm:$0xff] %v2197_v51  ;;  %v2200_v27 = vadd.f32 %v2734_v21, %v3981_v34  ;;  %v2191_v22 = vpop.f32.mrb[63].mxu0 }
 0xa74   :  { %2215 = vst [vmem:[#allocation9 + $0x60] sm:$0xff] %v2189_v13  ;;  %v2192_v42 = vadd.f32 %v3981_v34, %v2191_v22 }
 0xa75   :  { %2218 = vst [vmem:[#allocation9 + $0x78] sm:$0xff] %v2200_v27 }
 0xa76   :  { %2216 = vst [vmem:[#allocation9 + $0x68] sm:$0xff] %v2192_v42 }
 0xa77   :  { %3156 = shalt.err (!%p3153_p0)
}
 0xa78   :  { %s3157_s19 = scalar_lea.hbm %s4043_s10, 2048 }
 0xa79   :  { %p3158_p1 = scmp.ne.s32.totalorder %s4043_s10, %s3157_s19  ;;  %p3161_p2 = scmp.lt.u32.totalorder %s3157_s19, %s4043_s10 }
 0xa7b   :  { %p3163_p3 = pnand %p3161_p2, %p3158_p1 }
 0xa7d   :  { %3166 = shalt.err (!%p3163_p3)
}
 0xa7e   :  { %2230 = dma.vmem_to_hbm [thread:$0]  %s2225_s16, 2048, %s4043_s10, [#allocation6], %s3183_s12, %s3183_s12, %s3184_s13  }
 0xa7f   :  { %3171 = dma.done.wait [#allocation6], 2048  }
 0xa80   :  { %3172 = vsyncadd [#allocation6], 4294965248 }
 0xa81   :  { %3173 = dma.done.wait [#allocation11], 256  }
 0xa82   :  { %3174 = vsyncadd [#allocation11], 4294967040 }
 0xa83   :  { %2249 = vsyncpa [#allocation5], 1 }
 0xa84   :  { %2250 = vsyncpa [#allocation8], 1 }
 0xa85   :  { %2251 = vsyncpa [#allocation6], 1 }
 0xa86   :  { %2252 = vsyncpa [#allocation11], 1 }

</bundles_post_ra>
